<compile_context>
chip_gen: v7x
topology: tpu7x:2x2x1
jax: 0.10.0
libtpu: 0.0.40
codegen_flags: <defaults>
</compile_context>

<pallas_src>
import functools

import jax
import jax.numpy as jnp
from jax import lax
from jax.experimental import pallas as pl
from jax.experimental.pallas import tpu as pltpu

# ---------------- model dimensions ----------------
INPUT_DIM = 3            # (x, y, t)
NUM_FOURIER = 32         # mapping_size
FOURIER_SIGMA = 1.0
MAPPED_DIM = 2 * NUM_FOURIER   # sin + cos
HIDDEN = [128, 128, 128]
OUT_DIM = 3              # (h, u, v)

DEFAULT_TILE_B = 8192    # per-grid-step batch tile (multiple of 128 / CHUNK_B)
CHUNK_B = 512            # in-kernel lane chunk (MXU/EUP overlap, small live temps)
VMEM_LIMIT_BYTES = 32 * 1024 * 1024   # explicit scoped-VMEM budget (fits all gens)


def _round_up(n, m):
    return ((n + m - 1) // m) * m


def pinn_kernel(xT_ref, bT_ref,
                w0_ref, b0_ref,
                w1_ref, b1_ref,
                w2_ref, b2_ref,
                w3_ref, b3_ref,
                out_ref, *, chunk, num_chunks):
    """One batch tile of the PINN forward, feature-major (batch on lanes).

    xT_ref : (3, TILE_B)     input coordinates (x, y, t) for this tile
    bT_ref : (32, 3)         Fourier matrix, transposed (B.T)
    w*_ref : (out, in)       PyTorch-native Linear weights (w0 is (128, 64))
    b*_ref : (out, 1)        biases, broadcast along the lane (batch) axis
    out_ref: (3, TILE_B)     (h, u, v) with softplus on the h row only
    """
    bT = bT_ref[...]                                  # (32, 3)
    w0 = w0_ref[...]; b0 = b0_ref[...]                # (128, 64), (128, 1)
    w1 = w1_ref[...]; b1 = b1_ref[...]
    w2 = w2_ref[...]; b2 = b2_ref[...]
    w3 = w3_ref[...]; b3 = b3_ref[...]                # (3, 128),  (3, 1)

    # Hoisted row mask for the softplus-on-h-row select (broadcast not CSE'd by JAX).
    row_is_h = lax.broadcasted_iota(jnp.int32, (OUT_DIM, chunk), 0) == 0

    def body(c, carry):
        start = pl.multiple_of(c * chunk, chunk)
        x = xT_ref[:, pl.ds(start, chunk)]            # (3, chunk)

        # Fourier projection (x @ B)^T == B^T @ x. K=3 is degenerate for the MXU,
        # so do it as 3 outer-product FMAs on the VPU.
        xp = bT[:, 0:1] * x[0:1, :]
        xp = xp + bT[:, 1:2] * x[1:2, :]
        xp = xp + bT[:, 2:3] * x[2:3, :]              # (32, chunk)

        # Stack sin over cos along the (sublane-aligned) feature axis -> one K=64
        # MXU pass for layer 0 instead of two K=32 passes.
        feats = jnp.concatenate([jnp.sin(xp), jnp.cos(xp)], axis=0)   # (64, chunk)

        h = jnp.tanh(jnp.dot(w0, feats, preferred_element_type=jnp.float32) + b0)
        # Hidden layers 1, 2 (dropout_rate = 0.0 -> no dropout at inference).
        h = jnp.tanh(jnp.dot(w1, h, preferred_element_type=jnp.float32) + b1)
        h = jnp.tanh(jnp.dot(w2, h, preferred_element_type=jnp.float32) + b2)

        # Output head: (h, u, v). Softplus on the water-depth row, single full store.
        y = jnp.dot(w3, h, preferred_element_type=jnp.float32) + b3  # (3, chunk)
        y = jnp.where(row_is_h, jnp.logaddexp(y, 0.0), y)            # stable softplus
        out_ref[:, pl.ds(start, chunk)] = y
        return carry

    lax.fori_loop(0, num_chunks, body, 0, unroll=True)


def _choose_tiles(B, tile_b):
    tb = min(tile_b, _round_up(max(B, 1), 128))
    # v7x: keep >= ~8 batch tiles on large batches so ("parallel",) can shard the
    # grid across both TensorCores (no-op for small B or single-TC v5e/v6e).
    if B >= 8 * 1024:
        tb = min(tb, max(1024, _round_up(-(-B // 8), 128)))
    if tb > CHUNK_B:
        tb = _round_up(tb, CHUNK_B)
        chunk = CHUNK_B
    else:
        chunk = tb
    return tb, chunk


@functools.partial(jax.jit, static_argnames=("tile_b",))
def pinn_forward(x, params, tile_b=DEFAULT_TILE_B):
    """x: (B, 3) float32 -> (B, 3) float32 = (h, u, v)."""
    B = x.shape[0]
    tb, chunk = _choose_tiles(B, tile_b)
    num_tiles = pl.cdiv(B, tb)
    Bp = num_tiles * tb

    # Pad the batch to a tile multiple and go feature-major (batch on lanes).
    xT = jnp.pad(x, ((0, Bp - B), (0, 0))).T                     # (3, Bp)
    bT = params["B"].T                                           # (32, 3)

    operands = (xT, bT,
                params["w0"], params["b0"],
                params["w1"], params["b1"],
                params["w2"], params["b2"],
                params["w3"], params["b3"])

    data_spec = pl.BlockSpec((INPUT_DIM, tb), lambda i: (0, i))
    out_spec = pl.BlockSpec((OUT_DIM, tb), lambda i: (0, i))

    def const_spec(a):
        # Full-array block, constant index map -> VMEM-resident across the grid.
        return pl.BlockSpec(a.shape, lambda i: (0, 0))

    in_specs = [data_spec] + [const_spec(a) for a in operands[1:]]

    kernel = functools.partial(pinn_kernel, chunk=chunk, num_chunks=tb // chunk)

    outT = pl.pallas_call(
        kernel,
        out_shape=jax.ShapeDtypeStruct((OUT_DIM, Bp), jnp.float32),
        grid=(num_tiles,),
        in_specs=in_specs,
        out_specs=out_spec,
        compiler_params=pltpu.CompilerParams(
            dimension_semantics=("parallel",),        # 2x on v7x's two TCs
            vmem_limit_bytes=VMEM_LIMIT_BYTES),
    )(*operands)

    return outT.T[:B]


def init_params(key):
    """Deterministic parameter init mirroring the PyTorch module's __init__."""
    keys = jax.random.split(key, 8)
    # Fourier buffer: randn(input_dim, mapping_size) * scale
    bmat = jax.random.normal(keys[0], (INPUT_DIM, NUM_FOURIER),
                             dtype=jnp.float32) * FOURIER_SIGMA

    def xavier_normal(k, fan_out, fan_in):
        std = jnp.sqrt(2.0 / (fan_in + fan_out)).astype(jnp.float32)
        # PyTorch-native orientation: (out_features, in_features)
        return jax.random.normal(k, (fan_out, fan_in), dtype=jnp.float32) * std

    dims = [MAPPED_DIM] + HIDDEN + [OUT_DIM]
    params = {"B": bmat}
    for i in range(len(dims) - 1):
        params[f"w{i}"] = xavier_normal(keys[i + 1], dims[i + 1], dims[i])
        params[f"b{i}"] = jnp.zeros((dims[i + 1], 1), dtype=jnp.float32)
    return params


def pinn_forward_ref(x, params):
    """Pure-JAX reference of the same forward for correctness checking."""
    xp = x @ params["B"]
    h = jnp.concatenate([jnp.sin(xp), jnp.cos(xp)], axis=-1)
    for i in range(3):
        h = jnp.tanh(h @ params[f"w{i}"].T + params[f"b{i}"].T)
    y = h @ params["w3"].T + params["b3"].T
    h_col = jax.nn.softplus(y[:, 0:1])
    return jnp.concatenate([h_col, y[:, 1:]], axis=-1)


if __name__ == "__main__":
    key = jax.random.PRNGKey(0)
    pkey, xkey = jax.random.split(key)
    params = init_params(pkey)

    # Small deterministic example (non-multiple of the tile size to exercise the
    # padding path). For perf benchmarking use B >= 1e5 and xprof min-of-N.
    batch = 200
    x = jax.random.normal(xkey, (batch, INPUT_DIM), dtype=jnp.float32)  # (x, y, t)

    out = pinn_forward(x, params)
    out = jax.block_until_ready(out)

    ref = pinn_forward_ref(x, params)
    assert out.shape == (batch, OUT_DIM)
    assert jnp.allclose(out, ref, atol=2e-4, rtol=2e-4), "mismatch vs reference"

    print("KERNEL_OK")
</pallas_src>

<mosaic_0001>
module attributes {stable_mosaic.version = 11 : i64} {
  func.func @pinn_kernel(%arg0: i32, %arg1: memref<3x256xf32, #tpu.memory_space<vmem>>, %arg2: memref<32x3xf32, #tpu.memory_space<vmem>>, %arg3: memref<128x64xf32, #tpu.memory_space<vmem>>, %arg4: memref<128x1xf32, #tpu.memory_space<vmem>>, %arg5: memref<128x128xf32, #tpu.memory_space<vmem>>, %arg6: memref<128x1xf32, #tpu.memory_space<vmem>>, %arg7: memref<128x128xf32, #tpu.memory_space<vmem>>, %arg8: memref<128x1xf32, #tpu.memory_space<vmem>>, %arg9: memref<3x128xf32, #tpu.memory_space<vmem>>, %arg10: memref<3x1xf32, #tpu.memory_space<vmem>>, %arg11: memref<3x256xf32, #tpu.memory_space<vmem>>) attributes {dimension_semantics = [#tpu.dimension_semantics<parallel>], iteration_bounds = array<i64: 1>, scalar_prefetch = 0 : i64, scratch_operands = 0 : i64, tpu.core_type = #tpu.core_type<tc>, window_params = [{transform_indices = @transform_0, window_bounds = array<i64: 3, 256>}, {pipeline_mode = #tpu.pipeline_mode<synchronous>, transform_indices = @transform_1, window_bounds = array<i64: 32, 3>}, {pipeline_mode = #tpu.pipeline_mode<synchronous>, transform_indices = @transform_2, window_bounds = array<i64: 128, 64>}, {pipeline_mode = #tpu.pipeline_mode<synchronous>, transform_indices = @transform_3, window_bounds = array<i64: 128, 1>}, {pipeline_mode = #tpu.pipeline_mode<synchronous>, transform_indices = @transform_4, window_bounds = array<i64: 128, 128>}, {pipeline_mode = #tpu.pipeline_mode<synchronous>, transform_indices = @transform_5, window_bounds = array<i64: 128, 1>}, {pipeline_mode = #tpu.pipeline_mode<synchronous>, transform_indices = @transform_6, window_bounds = array<i64: 128, 128>}, {pipeline_mode = #tpu.pipeline_mode<synchronous>, transform_indices = @transform_7, window_bounds = array<i64: 128, 1>}, {pipeline_mode = #tpu.pipeline_mode<synchronous>, transform_indices = @transform_8, window_bounds = array<i64: 3, 128>}, {pipeline_mode = #tpu.pipeline_mode<synchronous>, transform_indices = @transform_9, window_bounds = array<i64: 3, 1>}, {transform_indices = @transform_10, window_bounds = array<i64: 3, 256>}]} {
    %c0 = arith.constant 0 : index
    %c0_0 = arith.constant 0 : index
    %0 = vector.load %arg2[%c0, %c0_0] : memref<32x3xf32, #tpu.memory_space<vmem>>, vector<32x3xf32>
    %c0_1 = arith.constant 0 : index
    %c0_2 = arith.constant 0 : index
    %1 = vector.load %arg3[%c0_1, %c0_2] : memref<128x64xf32, #tpu.memory_space<vmem>>, vector<128x64xf32>
    %c0_3 = arith.constant 0 : index
    %c0_4 = arith.constant 0 : index
    %2 = vector.load %arg4[%c0_3, %c0_4] : memref<128x1xf32, #tpu.memory_space<vmem>>, vector<128x1xf32>
    %c0_5 = arith.constant 0 : index
    %c0_6 = arith.constant 0 : index
    %3 = vector.load %arg5[%c0_5, %c0_6] : memref<128x128xf32, #tpu.memory_space<vmem>>, vector<128x128xf32>
    %c0_7 = arith.constant 0 : index
    %c0_8 = arith.constant 0 : index
    %4 = vector.load %arg6[%c0_7, %c0_8] : memref<128x1xf32, #tpu.memory_space<vmem>>, vector<128x1xf32>
    %c0_9 = arith.constant 0 : index
    %c0_10 = arith.constant 0 : index
    %5 = vector.load %arg7[%c0_9, %c0_10] : memref<128x128xf32, #tpu.memory_space<vmem>>, vector<128x128xf32>
    %c0_11 = arith.constant 0 : index
    %c0_12 = arith.constant 0 : index
    %6 = vector.load %arg8[%c0_11, %c0_12] : memref<128x1xf32, #tpu.memory_space<vmem>>, vector<128x1xf32>
    %c0_13 = arith.constant 0 : index
    %c0_14 = arith.constant 0 : index
    %7 = vector.load %arg9[%c0_13, %c0_14] : memref<3x128xf32, #tpu.memory_space<vmem>>, vector<3x128xf32>
    %c0_15 = arith.constant 0 : index
    %c0_16 = arith.constant 0 : index
    %8 = vector.load %arg10[%c0_15, %c0_16] : memref<3x1xf32, #tpu.memory_space<vmem>>, vector<3x1xf32>
    %9 = tpu.iota {dimensions = array<i32: 0>} : vector<3x256xi32>
    %c0_i32 = arith.constant 0 : i32
    %10 = vector.broadcast %c0_i32 : i32 to vector<3x256xi32>
    %11 = arith.cmpi eq, %9, %10 : vector<3x256xi32>
    %c0_i32_17 = arith.constant 0 : i32
    %c256_i32 = arith.constant 256 : i32
    %12 = arith.muli %c0_i32_17, %c256_i32 : i32
    %13 = tpu.assume_multiple %12, 256 : i32
    %c0_18 = arith.constant 0 : index
    %14 = arith.index_cast %13 : i32 to index
    %15 = vector.load %arg1[%c0_18, %14] : memref<3x256xf32, #tpu.memory_space<vmem>>, vector<3x256xf32>
    %16 = vector.extract_strided_slice %0 {offsets = [0, 0], sizes = [32, 1], strides = [1, 1]} : vector<32x3xf32> to vector<32x1xf32>
    %17 = vector.extract_strided_slice %15 {offsets = [0, 0], sizes = [1, 256], strides = [1, 1]} : vector<3x256xf32> to vector<1x256xf32>
    %18 = vector.broadcast %16 : vector<32x1xf32> to vector<32x256xf32>
    %19 = vector.broadcast %17 : vector<1x256xf32> to vector<32x256xf32>
    %20 = arith.mulf %18, %19 : vector<32x256xf32>
    %21 = vector.extract_strided_slice %0 {offsets = [0, 1], sizes = [32, 1], strides = [1, 1]} : vector<32x3xf32> to vector<32x1xf32>
    %22 = vector.extract_strided_slice %15 {offsets = [1, 0], sizes = [1, 256], strides = [1, 1]} : vector<3x256xf32> to vector<1x256xf32>
    %23 = vector.broadcast %21 : vector<32x1xf32> to vector<32x256xf32>
    %24 = vector.broadcast %22 : vector<1x256xf32> to vector<32x256xf32>
    %25 = arith.mulf %23, %24 : vector<32x256xf32>
    %26 = arith.addf %20, %25 : vector<32x256xf32>
    %27 = vector.extract_strided_slice %0 {offsets = [0, 2], sizes = [32, 1], strides = [1, 1]} : vector<32x3xf32> to vector<32x1xf32>
    %28 = vector.extract_strided_slice %15 {offsets = [2, 0], sizes = [1, 256], strides = [1, 1]} : vector<3x256xf32> to vector<1x256xf32>
    %29 = vector.broadcast %27 : vector<32x1xf32> to vector<32x256xf32>
    %30 = vector.broadcast %28 : vector<1x256xf32> to vector<32x256xf32>
    %31 = arith.mulf %29, %30 : vector<32x256xf32>
    %32 = arith.addf %26, %31 : vector<32x256xf32>
    %33 = math.sin %32 : vector<32x256xf32>
    %34 = math.cos %32 : vector<32x256xf32>
    %35 = tpu.concatenate %33, %34 in 0 : vector<32x256xf32>, vector<32x256xf32> -> vector<64x256xf32>
    %cst = arith.constant dense<0.000000e+00> : vector<128x256xf32>
    %36 = tpu.matmul %1, %35, %cst {dimension_numbers = #tpu.dot_dimension_numbers<[1], [0], [0], [1], [0, 0, 1, 1], [], []>} : vector<128x64xf32>, vector<64x256xf32>, vector<128x256xf32> -> vector<128x256xf32>
    %37 = vector.broadcast %2 : vector<128x1xf32> to vector<128x256xf32>
    %38 = arith.addf %36, %37 : vector<128x256xf32>
    %39 = math.tanh %38 : vector<128x256xf32>
    %cst_19 = arith.constant dense<0.000000e+00> : vector<128x256xf32>
    %40 = tpu.matmul %3, %39, %cst_19 {dimension_numbers = #tpu.dot_dimension_numbers<[1], [0], [0], [1], [0, 0, 1, 1], [], []>} : vector<128x128xf32>, vector<128x256xf32>, vector<128x256xf32> -> vector<128x256xf32>
    %41 = vector.broadcast %4 : vector<128x1xf32> to vector<128x256xf32>
    %42 = arith.addf %40, %41 : vector<128x256xf32>
    %43 = math.tanh %42 : vector<128x256xf32>
    %cst_20 = arith.constant dense<0.000000e+00> : vector<128x256xf32>
    %44 = tpu.matmul %5, %43, %cst_20 {dimension_numbers = #tpu.dot_dimension_numbers<[1], [0], [0], [1], [0, 0, 1, 1], [], []>} : vector<128x128xf32>, vector<128x256xf32>, vector<128x256xf32> -> vector<128x256xf32>
    %45 = vector.broadcast %6 : vector<128x1xf32> to vector<128x256xf32>
    %46 = arith.addf %44, %45 : vector<128x256xf32>
    %47 = math.tanh %46 : vector<128x256xf32>
    %cst_21 = arith.constant dense<0.000000e+00> : vector<3x256xf32>
    %48 = tpu.matmul %7, %47, %cst_21 {dimension_numbers = #tpu.dot_dimension_numbers<[1], [0], [0], [1], [0, 0, 1, 1], [], []>} : vector<3x128xf32>, vector<128x256xf32>, vector<3x256xf32> -> vector<3x256xf32>
    %49 = vector.broadcast %8 : vector<3x1xf32> to vector<3x256xf32>
    %50 = arith.addf %48, %49 : vector<3x256xf32>
    %cst_22 = arith.constant 0.000000e+00 : f32
    %51 = vector.broadcast %cst_22 : f32 to vector<3x256xf32>
    %52 = arith.maximumf %50, %51 : vector<3x256xf32>
    %53 = vector.broadcast %cst_22 : f32 to vector<3x256xf32>
    %54 = arith.subf %50, %53 : vector<3x256xf32>
    %55 = arith.cmpf one, %54, %54 : vector<3x256xf32>
    %56 = vector.broadcast %cst_22 : f32 to vector<3x256xf32>
    %57 = arith.addf %50, %56 : vector<3x256xf32>
    %58 = math.absf %54 : vector<3x256xf32>
    %cst_23 = arith.constant 0.000000e+00 : f32
    %59 = vector.broadcast %cst_23 : f32 to vector<3x256xf32>
    %60 = arith.subf %59, %58 : vector<3x256xf32>
    %61 = math.exp %60 : vector<3x256xf32>
    %62 = math.log1p %61 : vector<3x256xf32>
    %63 = arith.addf %52, %62 : vector<3x256xf32>
    %64 = arith.select %55, %57, %63 : vector<3x256xi1>, vector<3x256xf32>
    %65 = arith.select %11, %64, %50 : vector<3x256xi1>, vector<3x256xf32>
    %c0_24 = arith.constant 0 : index
    %66 = arith.index_cast %13 : i32 to index
    %67 = vector.load %arg11[%c0_24, %66] : memref<3x256xf32, #tpu.memory_space<vmem>>, vector<3x256xf32>
    tpu.vector_store %arg11[%c0_24, %66], %65 {strides = array<i32>} : memref<3x256xf32, #tpu.memory_space<vmem>>, vector<3x256xf32>,
    %c1_i32 = arith.constant 1 : i32
    return
  }
  func.func @transform_0(%arg0: i32) -> (i32, i32) {
    %c0_i32 = arith.constant 0 : i32
    %c0_i32_0 = arith.constant 0 : i32
    return %c0_i32, %arg0 : i32, i32
  }
  func.func @transform_1(%arg0: i32) -> (i32, i32) {
    %c0_i32 = arith.constant 0 : i32
    %c0_i32_0 = arith.constant 0 : i32
    %c0_i32_1 = arith.constant 0 : i32
    return %c0_i32, %c0_i32_0 : i32, i32
  }
  func.func @transform_2(%arg0: i32) -> (i32, i32) {
    %c0_i32 = arith.constant 0 : i32
    %c0_i32_0 = arith.constant 0 : i32
    %c0_i32_1 = arith.constant 0 : i32
    return %c0_i32, %c0_i32_0 : i32, i32
  }
  func.func @transform_3(%arg0: i32) -> (i32, i32) {
    %c0_i32 = arith.constant 0 : i32
    %c0_i32_0 = arith.constant 0 : i32
    %c0_i32_1 = arith.constant 0 : i32
    return %c0_i32, %c0_i32_0 : i32, i32
  }
  func.func @transform_4(%arg0: i32) -> (i32, i32) {
    %c0_i32 = arith.constant 0 : i32
    %c0_i32_0 = arith.constant 0 : i32
    %c0_i32_1 = arith.constant 0 : i32
    return %c0_i32, %c0_i32_0 : i32, i32
  }
  func.func @transform_5(%arg0: i32) -> (i32, i32) {
    %c0_i32 = arith.constant 0 : i32
    %c0_i32_0 = arith.constant 0 : i32
    %c0_i32_1 = arith.constant 0 : i32
    return %c0_i32, %c0_i32_0 : i32, i32
  }
  func.func @transform_6(%arg0: i32) -> (i32, i32) {
    %c0_i32 = arith.constant 0 : i32
    %c0_i32_0 = arith.constant 0 : i32
    %c0_i32_1 = arith.constant 0 : i32
    return %c0_i32, %c0_i32_0 : i32, i32
  }
  func.func @transform_7(%arg0: i32) -> (i32, i32) {
    %c0_i32 = arith.constant 0 : i32
    %c0_i32_0 = arith.constant 0 : i32
    %c0_i32_1 = arith.constant 0 : i32
    return %c0_i32, %c0_i32_0 : i32, i32
  }
  func.func @transform_8(%arg0: i32) -> (i32, i32) {
    %c0_i32 = arith.constant 0 : i32
    %c0_i32_0 = arith.constant 0 : i32
    %c0_i32_1 = arith.constant 0 : i32
    return %c0_i32, %c0_i32_0 : i32, i32
  }
  func.func @transform_9(%arg0: i32) -> (i32, i32) {
    %c0_i32 = arith.constant 0 : i32
    %c0_i32_0 = arith.constant 0 : i32
    %c0_i32_1 = arith.constant 0 : i32
    return %c0_i32, %c0_i32_0 : i32, i32
  }
  func.func @transform_10(%arg0: i32) -> (i32, i32) {
    %c0_i32 = arith.constant 0 : i32
    %c0_i32_0 = arith.constant 0 : i32
    return %c0_i32, %arg0 : i32, i32
  }
}

</mosaic_0001>

<bundles_post_ra>
// kernel: pinn_forward.1
= control target key start
LH: loop header
LB: loop body
LE: loop exit
PB: predicated region body
PF: predicated region fallthrough
CT: control target
= control target key end

     0   :  { %v3454_v1 = vmov 1   ;;  %v3455_v2 = vmov 0   ;;  %s5156_s0 = inlined_call_operand.vmem [shape: f32[3,256], index: 0, kind: input, shape index: {}]   ;;  %s5157_s1 = inlined_call_operand.vmem [shape: f32[32,3], index: 1, kind: input, shape index: {}]   ;;  %s5158_s2 = inlined_call_operand.vmem [shape: f32[128,64], index: 2, kind: input, shape index: {}]   ;;  %s5159_s3 = inlined_call_operand.vmem [shape: f32[128,1], index: 3, kind: input, shape index: {}]   ;;  %s5160_s4 = inlined_call_operand.vmem [shape: f32[128,128], index: 4, kind: input, shape index: {}]   ;;  %s5161_s5 = inlined_call_operand.vmem [shape: f32[128,1], index: 5, kind: input, shape index: {}]   ;;  %s5162_s6 = inlined_call_operand.vmem [shape: f32[128,128], index: 6, kind: input, shape index: {}]   ;;  %s5163_s7 = inlined_call_operand.vmem [shape: f32[128,1], index: 7, kind: input, shape index: {}]   ;;  %s5164_s8 = inlined_call_operand.vmem [shape: f32[3,128], index: 8, kind: input, shape index: {}]   ;;  %s5165_s9 = inlined_call_operand.vmem [shape: f32[3,1], index: 9, kind: input, shape index: {}]   ;;  %s5166_s10 = inlined_call_operand.hbm [shape: f32[3,256], index: 10, kind: output, shape index: {}]  }
   0x1   :  { %v36_v0 = vld [vmem:[%s5157_s1] sm:$0xff]  ;;  %3190 = vset.pattern.permute.xlu1 %v3454_v1  ;;  %3189 = vset.pattern.permute.xlu0 %v3455_v2 }
   0x2   :  { %15 = vsyncpa [#allocation3], 0  ;;  %190 = vperm.xlu1 %3190, %v36_v0   ;;  %144 = vperm.xlu0 %3189, %v36_v0   ;;  %v37_v3 = vld [vmem:[%s5157_s1 + $0x8] sm:$0xff]  ;;  %v39_v4 = vld [vmem:[%s5157_s1 + $0x18] sm:$0xff]  ;;  %v3456_v5 = vmov 2   ;;  %v138_v7 = vlaneseq }
   0x3   :  { %v38_v6 = vld [vmem:[%s5157_s1 + $0x10] sm:$0xff]  ;;  %v141_v14 = vld [vmem:[%s5156_s0] sm:$0x77] }
   0x4   :  { %v3532_v8 = vshrl.u32 %v138_v7, 7 }
   0x6   :  { %194 = vperm.xlu1 %3190, %v37_v3   ;;  %149 = vperm.xlu0 %3189, %v37_v3   ;;  %5212 = vst [vmem:[#allocation5_spill] sm:$0xff] %v3532_v8  ;;  %v207_v11 = vsub.s32 1, %v3532_v8  ;;  %v165_v12 = vsub.s32 0, %v3532_v8  ;;  %v257_v13 = vsub.s32 2, %v3532_v8  ;;  %v211_v15 = vsub.s32 5, %v3532_v8 }
   0x7   :  { %v169_v16 = vsub.s32 4, %v3532_v8  ;;  %v261_v17 = vsub.s32 6, %v3532_v8  ;;  %v5229_v8 = vmov 2131351028  }
   0x8   :  { %v208_v19 = vrot.slane %v141_v14, %v207_v11  ;;  %v166_v20 = vrot.slane %v141_v14, %v165_v12  ;;  %v258_v22 = vrot.slane %v141_v14, %v257_v13  ;;  %v212_v23 = vrot.slane %v141_v14, %v211_v15 }
   0x9   :  { %v170_v24 = vrot.slane %v141_v14, %v169_v16  ;;  %v262_v25 = vrot.slane %v141_v14, %v261_v17 }
   0xa   :  { %3191 = vset.pattern.permute.xlu1 %v3456_v5  ;;  %159 = vperm.xlu0 %3189, %v39_v4   ;;  %v3543_v26 = vrot.slane %v208_v19, %v207_v11  ;;  %v3545_v27 = vrot.slane %v166_v20, %v165_v12  ;;  %v3547_v28 = vrot.slane %v258_v22, %v257_v13 }
   0xb   :  { %244 = vperm.xlu1 %3191, %v37_v3   ;;  %v3549_v30 = vrot.slane %v212_v23, %v207_v11  ;;  %v3551_v31 = vrot.slane %v170_v24, %v165_v12  ;;  %v3555_v34 = vrot.slane %v262_v25, %v257_v13 }
   0xe   :  { %3193 = vset.pattern.permute.xlu0 %v3456_v5 }
   0xf   :  { %3192 = vset.pattern.permute.xlu1 %v3455_v2  ;;  %240 = vperm.xlu0 %3193, %v36_v0  }
  0x10   :  { %154 = vperm.xlu1 %3192, %v38_v6  }
  0x13   :  { %248 = vperm.xlu0 %3193, %v38_v6  }
  0x14   :  { %3194 = vset.pattern.permute.xlu1 %v3454_v1 }
  0x15   :  { %198 = vperm.xlu1 %3194, %v38_v6  }
  0x17   :  { %3197 = vset.pattern.permute.xlu0 %v3455_v2 }
  0x19   :  { %202 = vperm.xlu1 %3194, %v39_v4  }
  0x1d   :  { %3195 = vset.pattern.permute.xlu1 %v3456_v5 }
  0x1e   :  { %252 = vperm.xlu1 %3195, %v39_v4  }
  0x22   :  { %3196 = vset.pattern.permute.xlu1 %v3455_v2 }
  0x81   :  { %v191_v9 = vpop.permute.xlu1 %190  ;;  %v145_v10 = vpop.permute.xlu0 %144 }
  0x82   :  { %v224_v45 = vmul.f32 %v3549_v30, %v191_v9  ;;  %v182_v46 = vmul.f32 %v3551_v31, %v145_v10  ;;  %v223_v53 = vmul.f32 %v3543_v26, %v191_v9  ;;  %v181_v54 = vmul.f32 %v3545_v27, %v145_v10 }
  0x84   :  { %v232_v51 = vadd.f32 %v224_v45, %v182_v46  ;;  %v231_v63 = vadd.f32 %v223_v53, %v181_v54 }
  0x85   :  { %v195_v18 = vpop.permute.xlu1 %194  ;;  %v150_v21 = vpop.permute.xlu0 %149 }
  0x86   :  { %v225_v32 = vmul.f32 %v3543_v26, %v195_v18  ;;  %v183_v33 = vmul.f32 %v3545_v27, %v150_v21  ;;  %v226_v36 = vmul.f32 %v3549_v30, %v195_v18  ;;  %v184_v37 = vmul.f32 %v3551_v31, %v150_v21 }
  0x88   :  { %v233_v39 = vadd.f32 %v225_v32, %v183_v33  ;;  %v234_v42 = vadd.f32 %v226_v36, %v184_v37 }
  0x89   :  { %v160_v35 = vpop.permute.xlu0 %159 }
  0x8a   :  { %v245_v29 = vpop.permute.xlu1 %244  ;;  %v187_v36 = vmul.f32 %v3545_v27, %v160_v35  ;;  %v188_v37 = vmul.f32 %v3551_v31, %v160_v35 }
  0x8b   :  { %v275_v38 = vmul.f32 %v3547_v28, %v245_v29  ;;  %v276_v40 = vmul.f32 %v3555_v34, %v245_v29 }
  0x8d   :  { %v3561_v43 = vadd.f32 %v275_v38, %v233_v39  ;;  %v3565_v47 = vadd.f32 %v276_v40, %v234_v42 }
  0x8e   :  { %v241_v44 = vpop.permute.xlu0 %240 }
  0x8f   :  { %v155_v41 = vpop.permute.xlu1 %154  ;;  %5213 = vst [vmem:[#allocation6_spill] sm:$0xff] %v3561_v43  ;;  %5214 = vst [vmem:[#allocation7_spill] sm:$0xff] %v3565_v47  ;;  %v274_v48 = vmul.f32 %v3555_v34, %v241_v44  ;;  %v500_v49 = vand.u32 2139095040, %v3561_v43  ;;  %v604_v52 = vand.u32 2139095040, %v3565_v47  ;;  %v273_v59 = vmul.f32 %v3547_v28, %v241_v44 }
  0x90   :  { %v185_v60 = vmul.f32 %v3545_v27, %v155_v41  ;;  %v186_v4 = vmul.f32 %v3551_v31, %v155_v41  ;;  %v5170_v22 = vand.u32 2147483647, %v3565_v47 }
  0x91   :  { %v3572_v55 = vadd.f32 %v274_v48, %v232_v51  ;;  %v501_v57 = vshrl.u32 %v500_v49, 23  ;;  %v605_v61 = vshrl.u32 %v604_v52, 23  ;;  %v3581_v5 = vadd.f32 %v273_v59, %v231_v63 }
  0x92   :  { %v249_v58 = vpop.permute.xlu0 %248  ;;  %v3605_v45 = vand.u32 8388607, %v5170_v22 }
  0x93   :  { %5215 = vst [vmem:[#allocation8_spill] sm:$0xff] %v3572_v55  ;;  %v396_v0 = vand.u32 2139095040, %v3572_v55  ;;  %v277_v2 = vmul.f32 %v3547_v28, %v249_v58  ;;  %v2954_v3 = vadd.s32 4294967169, %v501_v57  ;;  %5216 = vst [vmem:[#allocation9_spill] sm:$0xff] %v3581_v5  ;;  %v2958_v6 = vadd.s32 4294967169, %v605_v61 }
  0x94   :  { %v199_v50 = vpop.permute.xlu1 %198  ;;  %v278_v9 = vmul.f32 %v3555_v34, %v249_v58  ;;  %v292_v13 = vand.u32 2139095040, %v3581_v5  ;;  %v5171_v21 = vand.u32 2147483647, %v3572_v55  ;;  %v5178_v61 = vmov 2102212464  }
  0x95   :  { %v227_v56 = vmul.f32 %v3543_v26, %v199_v50  ;;  %v228_v62 = vmul.f32 %v3549_v30, %v199_v50  ;;  %v397_v10 = vshrl.u32 %v396_v0, 23  ;;  %v507_v12 = vadd.s32 1, %v2954_v3 }
  0x96   :  { %v611_v14 = vadd.s32 1, %v2958_v6  ;;  %v293_v20 = vshrl.u32 %v292_v13, 23  ;;  %v3601_v44 = vand.u32 8388607, %v5171_v21 }
  0x97   :  { %v235_v1 = vadd.f32 %v227_v56, %v185_v60  ;;  %v236_v7 = vadd.f32 %v228_v62, %v186_v4  ;;  %v2950_v16 = vadd.s32 4294967169, %v397_v10  ;;  %vm508_vm0 = vcmp.gt.s32.totalorder %v507_v12, 0 }
  0x98   :  { %v203_v18 = vpop.permute.xlu1 %202  ;;  %vm612_vm1 = vcmp.gt.s32.totalorder %v611_v14, 0  ;;  %v509_v25 = vsel %vm508_vm0, %v507_v12, 0  ;;  %v2946_v41 = vadd.s32 4294967169, %v293_v20  ;;  %v5174_v10 = vmov 2475754826  }
  0x99   :  { %v3584_v11 = vadd.f32 %v277_v2, %v235_v1  ;;  %v3587_v15 = vadd.f32 %v278_v9, %v236_v7  ;;  %v403_v29 = vadd.s32 1, %v2950_v16  ;;  %v613_v40 = vsel %vm612_vm1, %v611_v14, 0 }
  0x9a   :  { %v3607_v46 = vand.u32 31, %v509_v25  ;;  %v229_v27 = vmul.f32 %v3543_v26, %v203_v18  ;;  %v3610_v31 = vshrl.u32 %v509_v25, 5  ;;  %v230_v52 = vmul.f32 %v3549_v30, %v203_v18 }
  0x9b   :  { %5217 = vst [vmem:[#allocation10_spill] sm:$0xff] %v3584_v11  ;;  %5218 = vst [vmem:[#allocation11_spill] sm:$0xff] %v3587_v15  ;;  %v5167_v17 = vand.u32 2147483647, %v3584_v11  ;;  %v708_v19 = vand.u32 2139095040, %v3584_v11  ;;  %v812_v24 = vand.u32 2139095040, %v3587_v15 }
  0x9c   :  { %v5169_v33 = vand.u32 2147483647, %v3587_v15  ;;  %5219 = vst [vmem:[#allocation12_spill] sm:$0xff] %v3607_v46  ;;  %vm404_vm2 = vcmp.gt.s32.totalorder %v403_v29, 0  ;;  %v3618_v54 = vshrl.u32 %v613_v40, 5  ;;  %v3620_v56 = vand.u32 31, %v613_v40 }
  0x9d   :  { %v709_v23 = vshrl.u32 %v708_v19, 23  ;;  %v712_v32 = vand.u32 8388607, %v5167_v17  ;;  %v813_v39 = vshrl.u32 %v812_v24, 23  ;;  %v253_v42 = vpop.permute.xlu1 %252  ;;  %v3622_v57 = vadd.s32 1, %v2946_v41 }
  0x9e   :  { %v3614_v50 = vand.u32 8388607, %v5169_v33  ;;  %v279_v53 = vmul.f32 %v3547_v28, %v253_v42  ;;  %v3625_v58 = vsub.s32 32, %v3607_v46  ;;  %v237_v60 = vadd.f32 %v229_v27, %v187_v36 }
  0x9f   :  { %v2962_v38 = vadd.s32 4294967169, %v709_v23  ;;  %v2966_v49 = vadd.s32 4294967169, %v813_v39  ;;  %v713_v35 = vor.u32 8388608, %v712_v32  ;;  %v3629_v62 = vshll.u32 %v5178_v61, %v3607_v46 }
  0xa0   :  { %5220 = vst [vmem:[#allocation13_spill] sm:$0xff] %v3625_v58  ;;  %v5180_v30 = vmov 920167782   ;;  %v3636_v63 = vsel %vm404_vm2, %v403_v29, 0  ;;  %v817_v2 = vor.u32 8388608, %v3614_v50  ;;  %v238_v3 = vadd.f32 %v230_v52, %v188_v37 }
  0xa1   :  { %v715_v48 = vadd.s32 1, %v2962_v38  ;;  %v819_v51 = vadd.s32 1, %v2966_v49  ;;  %v3633_v28 = vshll.u32 %v5180_v30, %v3607_v46  ;;  %v3638_v0 = vshll.u32 %v713_v35, 8 }
  0xa2   :  { %v3641_v4 = vadd.f32 %v279_v53, %v237_v60  ;;  %v5176_v7 = vmov 683565275   ;;  %v5172_v16 = vmov 2131351028   ;;  %v5183_v29 = vmov 1326507024  }
  0xa3   :  { %vm716_vm3 = vcmp.gt.s32.totalorder %v715_v48, 0  ;;  %vm820_vm4 = vcmp.gt.s32.totalorder %v819_v51, 0  ;;  %v280_v35 = vmul.f32 %v3555_v34, %v253_v42  ;;  %vm300_vm15 = vcmp.gt.s32.totalorder %v3622_v57, 0 }
  0xa4   :  { %v717_v26 = vsel %vm716_vm3, %v715_v48, 0  ;;  %5221 = vst [vmem:[#allocation14_spill] sm:$0xff] %v3641_v4  ;;  %v821_v13 = vsel %vm820_vm4, %v819_v51, 0  ;;  %v916_v39 = vand.u32 2139095040, %v3641_v4  ;;  %v5230_v46 = vmov 1326507024  }
  0xa5   :  { %v719_v59 = vand.u32 31, %v717_v26  ;;  %v3643_v6 = vshrl.u32 %v717_v26, 5  ;;  %v823_v48 = vand.u32 31, %v821_v13  ;;  %v3674_v42 = vshrl.u32 %v821_v13, 5 }
  0xa7   :  { %v720_v1 = vsub.s32 32, %v719_v59  ;;  %v722_v9 = vshll.u32 %v5176_v7, %v719_v59  ;;  %v725_v12 = vshll.u32 %v5174_v10, %v719_v59  ;;  %v728_v19 = vshll.u32 %v5172_v16, %v719_v59 }
  0xa8   :  { %v731_v23 = vshll.u32 %v5178_v61, %v719_v59  ;;  %v734_v25 = vshll.u32 %v5180_v30, %v719_v59  ;;  %vm737_vm5 = vcmp.lt.s32.totalorder %v3643_v6, 1  ;;  %vm740_vm6 = vcmp.lt.s32.totalorder %v3643_v6, 4 }
  0xa9   :  { %v723_v14 = vshrl.u32 %v5174_v10, %v720_v1  ;;  %v726_v18 = vshrl.u32 %v5172_v16, %v720_v1  ;;  %v729_v20 = vshrl.u32 %v5178_v61, %v720_v1  ;;  %v732_v24 = vshrl.u32 %v5180_v30, %v720_v1 }
  0xaa   :  { %v735_v32 = vshrl.u32 %v5183_v29, %v720_v1  ;;  %vm739_vm7 = vcmp.lt.s32.totalorder %v3643_v6, 3  ;;  %v824_v52 = vsub.s32 32, %v823_v48  ;;  %vm738_vm8 = vcmp.lt.s32.totalorder %v3643_v6, 2 }
  0xab   :  { %v724_v36 = vor.u32 %v723_v14, %v722_v9  ;;  %v727_v37 = vor.u32 %v726_v18, %v725_v12  ;;  %v730_v38 = vor.u32 %v729_v20, %v728_v19  ;;  %v733_v40 = vor.u32 %v732_v24, %v731_v23 }
  0xac   :  { %v736_v41 = vor.u32 %v735_v32, %v734_v25  ;;  %v917_v59 = vshrl.u32 %v916_v39, 23  ;;  %v826_v20 = vshll.u32 %v5176_v7, %v823_v48  ;;  %v827_v23 = vshrl.u32 %v5174_v10, %v824_v52 }
  0xad   :  { %v745_v49 = vsel %vm737_vm5, %v724_v36, %v727_v37  ;;  %v749_v27 = vsel %vm737_vm5, %v727_v37, %v730_v38  ;;  %v746_v50 = vsel %vm740_vm6, %v733_v40, 920167782  ;;  %v742_v60 = vsel %vm740_vm6, %v730_v38, 2102212464 }
  0xae   :  { %v750_v51 = vsel %vm740_vm6, %v736_v41, 1326507024  ;;  %v747_v53 = vsel %vm739_vm7, %v730_v38, %v746_v50  ;;  %v829_v24 = vshll.u32 %v5174_v10, %v823_v48  ;;  %v830_v25 = vshrl.u32 %v5172_v16, %v824_v52 }
  0xaf   :  { %v751_v26 = vsel %vm739_vm7, %v733_v40, %v750_v51  ;;  %v748_v9 = vsel %vm738_vm8, %v745_v49, %v747_v53  ;;  %v832_v13 = vshll.u32 %v5172_v16, %v823_v48  ;;  %v833_v32 = vshrl.u32 %v5178_v61, %v824_v52 }
  0xb0   :  { %v752_v34 = vsel %vm738_vm8, %v749_v27, %v751_v26  ;;  %v3681_v18 = vmul.u32.u64.low %v3638_v0, %v748_v9  ;;  %v3682_v19 = vmul.u32.u64.high %v3638_v0, %v748_v9, %v3681_v18  ;;  %v835_v38 = vshll.u32 %v5178_v61, %v823_v48 }
  0xb1   :  { %v3677_v12 = vmul.u32.u64.low %v3638_v0, %v752_v34  ;;  %v3678_v14 = vmul.u32.u64.high %v3638_v0, %v752_v34, %v3677_v12  ;;  %v836_v39 = vshrl.u32 %v5180_v30, %v824_v52  ;;  %v828_v40 = vor.u32 %v827_v23, %v826_v20 }
  0xb2   :  { %v831_v41 = vor.u32 %v830_v25, %v829_v24  ;;  %v838_v49 = vshll.u32 %v5180_v30, %v823_v48  ;;  %v839_v27 = vshrl.u32 %v5183_v29, %v824_v52  ;;  %v721_v50 = vshrl.u32 %v5176_v7, %v720_v1 }
  0xb3   :  { %v834_v51 = vor.u32 %v833_v32, %v832_v13  ;;  %v3696_v53 = vshll.u32 %v817_v2, 8  ;;  %v3698_v26 = vadd.f32 %v280_v35, %v238_v3  ;;  %v837_v9 = vor.u32 %v836_v39, %v835_v38 }
  0xb4   :  { %v840_v34 = vor.u32 %v839_v27, %v838_v49  ;;  %vm841_vm9 = vcmp.lt.s32.totalorder %v3674_v42, 1  ;;  %v2970_v12 = vadd.s32 4294967169, %v917_v59  ;;  %v741_v20 = vsel %vm737_vm5, %v721_v50, %v724_v36 }
  0xb5   :  { %5222 = vst [vmem:[#allocation15_spill] sm:$0xff] %v3698_v26  ;;  %v743_v48 = vsel %vm739_vm7, %v727_v37, %v742_v60  ;;  %vm844_vm10 = vcmp.lt.s32.totalorder %v3674_v42, 4  ;;  %v849_v1 = vsel %vm841_vm9, %v828_v40, %v831_v41  ;;  %v763_v2 = vadd.s32 1, %v3682_v19 }
  0xb6   :  { %vm843_vm11 = vcmp.lt.s32.totalorder %v3674_v42, 3  ;;  %v850_v3 = vsel %vm844_vm10, %v837_v9, 920167782  ;;  %v853_v35 = vsel %vm841_vm9, %v831_v41, %v834_v51  ;;  %vm762_vm12 = vc.u32 %v3678_v14, %v3681_v18 }
  0xb7   :  { %vm842_vm13 = vcmp.lt.s32.totalorder %v3674_v42, 2  ;;  %v851_v36 = vsel %vm843_vm11, %v834_v51, %v850_v3  ;;  %v854_v37 = vsel %vm844_vm10, %v840_v34, 1326507024  ;;  %v744_v59 = vsel %vm738_vm8, %v741_v20, %v743_v48 }
  0xb8   :  { %v846_v60 = vsel %vm844_vm10, %v834_v51, 2102212464  ;;  %v852_v23 = vsel %vm842_vm13, %v849_v1, %v851_v36  ;;  %v855_v24 = vsel %vm843_vm11, %v837_v9, %v854_v37  ;;  %v825_v25 = vshrl.u32 %v5176_v7, %v824_v52 }
  0xb9   :  { %v856_v13 = vsel %vm842_vm13, %v853_v35, %v855_v24  ;;  %v3727_v32 = vmul.u32.u64.low %v3696_v53, %v852_v23  ;;  %v3728_v38 = vmul.u32.u64.high %v3696_v53, %v852_v23, %v3727_v32  ;;  %v764_v6 = vsel %vm762_vm12, %v763_v2, %v3682_v19 }
  0xba   :  { %v3733_v39 = vmul.u32.u64.low %v3696_v53, %v856_v13  ;;  %v3734_v49 = vmul.u32.u64.high %v3696_v53, %v856_v13, %v3733_v39  ;;  %v923_v27 = vadd.s32 1, %v2970_v12  ;;  %v3737_v50 = vsub.s32 32, %v3620_v56 }
  0xbb   :  { %v760_v52 = vmul.u32 %v3638_v0, %v744_v59  ;;  %v845_v51 = vsel %vm841_vm9, %v825_v25, %v828_v40  ;;  %v847_v9 = vsel %vm843_vm11, %v831_v41, %v846_v60  ;;  %v3746_v34 = vshll.u32 %v5178_v61, %v3620_v56 }
  0xbc   :  { %v3749_v19 = vand.u32 31, %v3636_v63  ;;  %v5168_v12 = vand.u32 2147483647, %v3641_v4  ;;  %vm924_vm14 = vcmp.gt.s32.totalorder %v923_v27, 0  ;;  %v1020_v40 = vand.u32 2139095040, %v3698_v26 }
  0xbd   :  { %v3753_v20 = vadd.s32 %v764_v6, %v760_v52  ;;  %v925_v0 = vsel %vm924_vm14, %v923_v27, 0  ;;  %v524_v41 = vshrl.u32 %v5180_v30, %v3625_v58  ;;  %v3760_v48 = vshll.u32 %v5180_v30, %v3620_v56 }
  0xbe   :  { %v848_v1 = vsel %vm842_vm13, %v845_v51, %v847_v9  ;;  %v867_v2 = vadd.s32 1, %v3728_v38  ;;  %v3767_v3 = vshrl.u32 %v5183_v29, %v3625_v58  ;;  %v3771_v35 = vshrl.u32 %v5180_v30, %v3737_v50 }
  0xbf   :  { %vm866_vm0 = vc.u32 %v3734_v49, %v3727_v32  ;;  %v927_v36 = vand.u32 31, %v925_v0  ;;  %v3777_v37 = vshrl.u32 %v5183_v29, %v3737_v50  ;;  %v301_v42 = vsel %vm300_vm15, %v3622_v57, 0 }
  0xc0   :  { %v3781_v59 = vsub.s32 32, %v3749_v19  ;;  %v920_v60 = vand.u32 8388607, %v5168_v12  ;;  %v766_v23 = vadd.s32 536870912, %v3753_v20  ;;  %v864_v24 = vmul.u32 %v3696_v53, %v848_v1 }
  0xc1   :  { %v928_v25 = vsub.s32 32, %v927_v36  ;;  %v1021_v13 = vshrl.u32 %v1020_v40, 23  ;;  %v868_v6 = vsel %vm866_vm0, %v867_v2, %v3728_v38  ;;  %v926_v39 = vshrl.u32 %v925_v0, 5 }
  0xc2   :  { %v930_v27 = vshll.u32 %v5176_v7, %v927_v36  ;;  %v933_v52 = vshll.u32 %v5174_v10, %v927_v36  ;;  %v936_v9 = vshll.u32 %v5172_v16, %v927_v36  ;;  %v939_v12 = vshll.u32 %v5178_v61, %v927_v36 }
  0xc3   :  { %v931_v57 = vshrl.u32 %v5174_v10, %v928_v25  ;;  %v934_v51 = vshrl.u32 %v5172_v16, %v928_v25  ;;  %v937_v17 = vshrl.u32 %v5178_v61, %v928_v25  ;;  %v940_v53 = vshrl.u32 %v5180_v30, %v928_v25 }
  0xc4   :  { %v942_v40 = vshll.u32 %v5180_v30, %v927_v36  ;;  %v943_v38 = vshrl.u32 %v5183_v29, %v928_v25  ;;  %v3799_v0 = vor.u32 %v524_v41, %v3629_v62  ;;  %v3801_v22 = vshrl.u32 %v766_v23, 30 }
  0xc5   :  { %v932_v1 = vor.u32 %v931_v57, %v930_v27  ;;  %v935_v2 = vor.u32 %v934_v51, %v933_v52  ;;  %v938_v33 = vor.u32 %v937_v17, %v936_v9  ;;  %v3803_v21 = vadd.s32 %v868_v6, %v864_v24 }
  0xc6   :  { %5223 = vst [vmem:[#allocation16_spill] sm:$0xff] %v3801_v22  ;;  %v941_v16 = vor.u32 %v940_v53, %v939_v12  ;;  %v944_v10 = vor.u32 %v943_v38, %v942_v40  ;;  %v921_v7 = vor.u32 8388608, %v920_v60  ;;  %vm945_vm1 = vcmp.lt.s32.totalorder %v926_v39, 1 }
  0xc7   :  { %vm948_vm2 = vcmp.lt.s32.totalorder %v926_v39, 4  ;;  %v2974_v61 = vadd.s32 4294967169, %v1021_v13  ;;  %v420_v36 = vshrl.u32 %v5180_v30, %v3781_v59  ;;  %vm947_vm3 = vcmp.lt.s32.totalorder %v926_v39, 3 }
  0xc8   :  { %v953_v62 = vsel %vm945_vm1, %v932_v1, %v935_v2  ;;  %v954_v41 = vsel %vm948_vm2, %v941_v16, 920167782  ;;  %v950_v27 = vsel %vm948_vm2, %v938_v33, 2102212464  ;;  %v957_v23 = vsel %vm945_vm1, %v935_v2, %v938_v33 }
  0xc9   :  { %v955_v17 = vsel %vm947_vm3, %v938_v33, %v954_v41  ;;  %v958_v24 = vsel %vm948_vm2, %v944_v10, 1326507024  ;;  %v768_v12 = vshll.u32 %v3801_v22, 30  ;;  %v870_v60 = vadd.s32 536870912, %v3803_v21 }
  0xca   :  { %v5224_v6 = vmov 683565275   ;;  %vm946_vm4 = vcmp.lt.s32.totalorder %v926_v39, 2  ;;  %v959_v57 = vsel %vm947_vm3, %v941_v16, %v958_v24  ;;  %v961_v51 = vshll.u32 %v921_v7, 8 }
  0xcb   :  { %v929_v52 = vshrl.u32 %v5224_v6, %v928_v25  ;;  %v956_v13 = vsel %vm946_vm4, %v953_v62, %v955_v17  ;;  %v1027_v9 = vadd.s32 1, %v2974_v61  ;;  %v423_v53 = vshrl.u32 %v5183_v29, %v3781_v59 }
  0xcc   :  { %v951_v33 = vsel %vm947_vm3, %v935_v2, %v950_v27  ;;  %v960_v10 = vsel %vm946_vm4, %v957_v23, %v959_v57  ;;  %v3823_v25 = vmul.u32.u64.low %v961_v51, %v956_v13  ;;  %v3824_v30 = vmul.u32.u64.high %v961_v51, %v956_v13, %v3823_v25 }
  0xcd   :  { %v949_v40 = vsel %vm945_vm1, %v929_v52, %v932_v1  ;;  %v3820_v38 = vmul.u32.u64.low %v961_v51, %v960_v10  ;;  %v3821_v41 = vmul.u32.u64.high %v961_v51, %v960_v10, %v3820_v38  ;;  %v3829_v61 = vshrl.u32 %v301_v42, 5 }
  0xce   :  { %v3832_v16 = vsub.s32 %v3753_v20, %v768_v12  ;;  %v3834_v1 = vshrl.u32 %v870_v60, 30  ;;  %v3836_v2 = vand.u32 31, %v301_v42  ;;  %v5226_v62 = vmov 2102212464  }
  0xcf   :  { %v419_v27 = vshll.u32 %v5226_v62, %v3749_v19  ;;  %v5227_v17 = vmov 920167782   ;;  %vm1028_vm5 = vcmp.gt.s32.totalorder %v1027_v9, 0  ;;  %v3843_v24 = vshrl.u32 %v3636_v63, 5 }
  0xd0   :  { %5225 = vst [vmem:[#allocation17_spill] sm:$0xff] %v3834_v1  ;;  %v422_v23 = vshll.u32 %v5227_v17, %v3749_v19  ;;  %v952_v52 = vsel %vm946_vm4, %v949_v40, %v951_v33  ;;  %v5182_v13 = vand.u32 2147483647, %v3698_v26  ;;  %v1029_v20 = vsel %vm1028_vm5, %v1027_v9, 0 }
  0xd1   :  { %v3847_v12 = vor.u32 %v420_v36, %v419_v27  ;;  %vm970_vm6 = vc.u32 %v3821_v41, %v3823_v25  ;;  %v971_v42 = vadd.s32 1, %v3824_v30  ;;  %v771_v57 = vsub.s32 0, %v3832_v16 }
  0xd2   :  { %v424_v60 = vor.u32 %v423_v53, %v422_v23  ;;  %v872_v10 = vshll.u32 %v3834_v1, 30  ;;  %v1031_v38 = vand.u32 31, %v1029_v20  ;;  %v5228_v63 = vmov 2475754826  }
  0xd3   :  { %v411_v39 = vshrl.u32 %v5228_v63, %v3781_v59  ;;  %v3858_v40 = vor.u32 %v3771_v35, %v3746_v34  ;;  %v968_v9 = vmul.u32 %v961_v51, %v952_v52  ;;  %v972_v53 = vsel %vm970_vm6, %v971_v42, %v3824_v30 }
  0xd4   :  { %v3864_v33 = vsub.s32 32, %v3836_v2  ;;  %vm428_vm7 = vcmp.lt.s32.totalorder %v3843_v24, 4  ;;  %v1024_v27 = vand.u32 8388607, %v5182_v13  ;;  %v410_v23 = vshll.u32 %v5224_v6, %v3749_v19 }
  0xd5   :  { %v3874_v34 = vsel %vm428_vm7, %v3847_v12, 920167782  ;;  %v3878_v35 = vsel %vm428_vm7, %v424_v60, 1326507024  ;;  %v3880_v30 = vadd.s32 %v972_v53, %v968_v9  ;;  %v1032_v51 = vsub.s32 32, %v1031_v38 }
  0xd6   :  { %v2963_v52 = vmin.u32 %v771_v57, %v3832_v16  ;;  %v3884_v42 = vsub.s32 %v3803_v21, %v872_v10  ;;  %v3886_v13 = vor.u32 %v411_v39, %v410_v23  ;;  %v413_v7 = vshll.u32 %v5228_v63, %v3749_v19 }
  0xd7   :  { %v1034_v36 = vshll.u32 %v5224_v6, %v1031_v38  ;;  %v1035_v29 = vshrl.u32 %v5228_v63, %v1032_v51  ;;  %v1037_v60 = vshll.u32 %v5228_v63, %v1031_v38  ;;  %v1038_v9 = vshrl.u32 %v5229_v8, %v1032_v51 }
  0xd8   :  { %v1025_v53 = vor.u32 8388608, %v1024_v27  ;;  %v3894_v22 = vshrl.u32 %v1029_v20, 5  ;;  %v1040_v57 = vshll.u32 %v5229_v8, %v1031_v38  ;;  %v1041_v21 = vshrl.u32 %v5226_v62, %v1032_v51 }
  0xd9   :  { %v974_v10 = vadd.s32 536870912, %v3880_v30  ;;  %v1036_v39 = vor.u32 %v1035_v29, %v1034_v36  ;;  %v1039_v23 = vor.u32 %v1038_v9, %v1037_v60  ;;  %v414_v1 = vshrl.u32 %v5229_v8, %v3781_v59 }
  0xda   :  { %v773_v4 = vclz %v2963_v52  ;;  %v1042_v26 = vor.u32 %v1041_v21, %v1040_v57  ;;  %v1043_v15 = vshll.u32 %v5226_v62, %v1031_v38  ;;  %v1044_v11 = vshrl.u32 %v5227_v17, %v1032_v51 }
  0xdb   :  { %v875_v20 = vsub.s32 0, %v3884_v42  ;;  %v1046_v27 = vshll.u32 %v5227_v17, %v1031_v38  ;;  %v1047_v47 = vshrl.u32 %v5230_v46, %v1032_v51  ;;  %v416_v58 = vshll.u32 %v5229_v8, %v3749_v19 }
  0xdc   :  { %v1045_v29 = vor.u32 %v1044_v11, %v1043_v15  ;;  %vm1049_vm8 = vcmp.lt.s32.totalorder %v3894_v22, 1  ;;  %v3909_v36 = vshll.u32 %v1025_v53, 8  ;;  %v417_v52 = vshrl.u32 %v5226_v62, %v3781_v59 }
  0xdd   :  { %v3913_v60 = vshrl.u32 %v974_v10, 30  ;;  %v1048_v9 = vor.u32 %v1047_v47, %v1046_v27  ;;  %vm1052_vm9 = vcmp.lt.s32.totalorder %v3894_v22, 4  ;;  %v1057_v38 = vsel %vm1049_vm8, %v1036_v39, %v1039_v23 }
  0xde   :  { %v2964_v57 = vadd.s32 4294967294, %v773_v4  ;;  %vm1051_vm10 = vcmp.lt.s32.totalorder %v3894_v22, 3  ;;  %v1058_v11 = vsel %vm1052_vm9, %v1045_v29, 920167782  ;;  %v1061_v15 = vsel %vm1049_vm8, %v1039_v23, %v1042_v26 }
  0xdf   :  { %v2967_v19 = vmin.u32 %v875_v20, %v3884_v42  ;;  %vm1050_vm11 = vcmp.lt.s32.totalorder %v3894_v22, 2  ;;  %v1059_v47 = vsel %vm1051_vm10, %v1042_v26, %v1058_v11  ;;  %v1062_v53 = vsel %vm1052_vm9, %v1048_v9, 1326507024 }
  0xe0   :  { %vm636_vm12 = vcmp.lt.s32.totalorder %v3618_v54, 4  ;;  %v1060_v4 = vsel %vm1050_vm11, %v1057_v38, %v1059_v47  ;;  %v1063_v21 = vsel %vm1051_vm10, %v1045_v29, %v1062_v53  ;;  %v415_v10 = vor.u32 %v414_v1, %v413_v7 }
  0xe1   :  { %v418_v27 = vor.u32 %v417_v52, %v416_v58  ;;  %v976_v20 = vshll.u32 %v3913_v60, 30  ;;  %v1064_v43 = vsel %vm1050_vm11, %v1061_v15, %v1063_v21  ;;  %v401_v38 = vor.u32 8388608, %v3601_v44 }
  0xe2   :  { %v3938_v11 = vmul.u32.u64.low %v3909_v36, %v1060_v4  ;;  %v3939_v55 = vmul.u32.u64.high %v3909_v36, %v1060_v4, %v3938_v11  ;;  %v3943_v9 = vmul.u32.u64.low %v3909_v36, %v1064_v43  ;;  %v3944_v5 = vmul.u32.u64.high %v3909_v36, %v1064_v43, %v3943_v9 }
  0xe3   :  { %v409_v7 = vshrl.u32 %v5224_v6, %v3781_v59  ;;  %v1033_v58 = vshrl.u32 %v5224_v6, %v1032_v51  ;;  %v1054_v1 = vsel %vm1052_vm9, %v1042_v26, 2102212464  ;;  %vm425_vm13 = vcmp.lt.s32.totalorder %v3843_v24, 1 }
  0xe4   :  { %vm427_vm14 = vcmp.lt.s32.totalorder %v3843_v24, 3  ;;  %vm2965_vm15 = vcmp.lt.s32.totalorder %v2964_v57, 0  ;;  %v433_v43 = vsel %vm425_vm13, %v3886_v13, %v415_v10  ;;  %v437_v59 = vsel %vm425_vm13, %v415_v10, %v418_v27 }
  0xe5   :  { %v435_v44 = vsel %vm427_vm14, %v418_v27, %v3874_v34  ;;  %v877_v51 = vclz %v2967_v19  ;;  %v3963_v29 = vsub.s32 %v3880_v30, %v976_v20  ;;  %v1053_v26 = vsel %vm1049_vm8, %v1033_v58, %v1036_v39 }
  0xe6   :  { %v430_v52 = vsel %vm428_vm7, %v418_v27, 2102212464  ;;  %v1055_v15 = vsel %vm1051_vm10, %v1039_v23, %v1054_v1  ;;  %vm426_vm0 = vcmp.lt.s32.totalorder %v3843_v24, 2  ;;  %v439_v34 = vsel %vm427_vm14, %v3847_v12, %v3878_v35 }
  0xe7   :  { %v441_v19 = vshll.u32 %v401_v38, 8  ;;  %v1075_v30 = vadd.s32 1, %v3939_v55  ;;  %v429_v39 = vsel %vm425_vm13, %v409_v7, %v3886_v13  ;;  %v436_v47 = vsel %vm426_vm0, %v433_v43, %v435_v44 }
  0xe8   :  { %v440_v23 = vsel %vm426_vm0, %v437_v59, %v439_v34  ;;  %vm1074_vm1 = vc.u32 %v3944_v5, %v3938_v11  ;;  %v431_v53 = vsel %vm427_vm14, %v415_v10, %v430_v52  ;;  %v642_v4 = vsel %vm636_vm12, %v3858_v40, 920167782 }
  0xe9   :  { %v3988_v12 = vmul.u32.u64.low %v441_v19, %v440_v23  ;;  %v3989_v35 = vmul.u32.u64.high %v441_v19, %v440_v23, %v3988_v12  ;;  %v3996_v13 = vshll.u32 %v5226_v62, %v3836_v2  ;;  %v3999_v21 = vsel %vm2965_vm15, 0, %v2964_v57 }
  0xea   :  { %v1056_v27 = vsel %vm1050_vm11, %v1053_v26, %v1055_v15  ;;  %v5231_v10 = vor.u32 %v3777_v37, %v3760_v48  ;;  %v2968_v9 = vadd.s32 4294967294, %v877_v51  ;;  %v4014_v58 = vshrl.u32 %v5227_v17, %v3864_v33 }
  0xeb   :  { %v4008_v38 = vmul.u32.u64.low %v441_v19, %v436_v47  ;;  %v4009_v7 = vmul.u32.u64.high %v441_v19, %v436_v47, %v4008_v38  ;;  %v4018_v57 = vshll.u32 %v5227_v17, %v3836_v2  ;;  %v1076_v22 = vsel %vm1074_vm1, %v1075_v30, %v3939_v55 }
  0xec   :  { %v646_v20 = vsel %vm636_vm12, %v5231_v10, 1326507024  ;;  %v432_v48 = vsel %vm426_vm0, %v429_v39, %v431_v53  ;;  %v781_v37 = vsub.s32 4294967266, %v3999_v21  ;;  %v979_v1 = vsub.s32 0, %v3963_v29 }
  0xed   :  { %v1072_v43 = vmul.u32 %v3909_v36, %v1056_v27  ;;  %v619_v44 = vshrl.u32 %v5228_v63, %v3737_v50  ;;  %vm450_vm2 = vc.u32 %v3989_v35, %v4008_v38  ;;  %v618_v17 = vshll.u32 %v5224_v6, %v3620_v56 }
  0xee   :  { %v621_v55 = vshll.u32 %v5228_v63, %v3620_v56  ;;  %v622_v24 = vshrl.u32 %v5229_v8, %v3737_v50  ;;  %vm2969_vm3 = vcmp.lt.s32.totalorder %v2968_v9, 0  ;;  %v448_v51 = vmul.u32 %v441_v19, %v432_v48 }
  0xef   :  { %v4036_v59 = vadd.s32 %v1076_v22, %v1072_v43  ;;  %v451_v36 = vadd.s32 1, %v4009_v7  ;;  %v620_v26 = vor.u32 %v619_v44, %v618_v17  ;;  %v624_v15 = vshll.u32 %v5229_v8, %v3620_v56 }
  0xf0   :  { %v623_v52 = vor.u32 %v622_v24, %v621_v55  ;;  %v625_v34 = vshrl.u32 %v5226_v62, %v3737_v50  ;;  %v761_v30 = vadd.s32 %v3681_v18, %v3678_v14  ;;  %v782_v39 = vadd.s32 127, %v781_v37 }
  0xf1   :  { %v2971_v47 = vmin.u32 %v979_v1, %v3963_v29  ;;  %v452_v23 = vsel %vm450_vm2, %v451_v36, %v4009_v7  ;;  %v4047_v53 = vsel %vm2969_vm3, 0, %v2968_v9  ;;  %vm635_vm4 = vcmp.lt.s32.totalorder %v3618_v54, 3 }
  0xf2   :  { %v453_v19 = vadd.s32 %v452_v23, %v448_v51  ;;  %v626_v12 = vor.u32 %v625_v34, %v624_v15  ;;  %vm532_vm5 = vcmp.lt.s32.totalorder %v3610_v31, 4  ;;  %v1078_v56 = vadd.s32 536870912, %v4036_v59  ;;  %v58_v23 = vld [vmem:[%s5159_s3 + $0x10] sm:$0xff] }
  0xf3   :  { %v609_v27 = vor.u32 8388608, %v3605_v45  ;;  %vm633_vm6 = vcmp.lt.s32.totalorder %v3618_v54, 1  ;;  %v647_v14 = vsel %vm635_vm4, %v3858_v40, %v646_v20  ;;  %v777_v18 = vsub.s32 32, %v3999_v21  ;;  %v56_v40 = vld [vmem:[%s5159_s3] sm:$0xff] }
  0xf4   :  { %v454_v10 = vadd.s32 536870912, %v453_v19  ;;  %v641_v9 = vsel %vm633_vm6, %v620_v26, %v623_v52  ;;  %v643_v7 = vsel %vm635_vm4, %v626_v12, %v642_v4  ;;  %v783_v22 = vshll.u32 %v782_v39, 23  ;;  %1947 = vperm.xlu1 %3196, %v56_v40  }
  0xf5   :  { %v981_v48 = vclz %v2971_v47  ;;  %vm634_vm7 = vcmp.lt.s32.totalorder %v3618_v54, 2  ;;  %v645_v45 = vsel %vm633_vm6, %v623_v52, %v626_v12  ;;  %v885_v20 = vsub.s32 4294967266, %v4047_v53 }
  0xf6   :  { %v4069_v37 = vshrl.u32 %v454_v10, 30  ;;  %v617_v1 = vshrl.u32 %v5224_v6, %v3737_v50  ;;  %v648_v4 = vsel %vm634_vm7, %v645_v45, %v647_v14  ;;  %v4075_v43 = vshrl.u32 %v1078_v56, 30 }
  0xf7   :  { %v638_v44 = vsel %vm636_vm12, %v626_v12, 2102212464  ;;  %v644_v17 = vsel %vm634_vm7, %v641_v9, %v643_v7  ;;  %v649_v55 = vshll.u32 %v609_v27, 8  ;;  %v319_v24 = vshrl.u32 %v5230_v46, %v3864_v33 }
  0xf8   :  { %v778_v51 = vshll.u32 %v3832_v16, %v3999_v21  ;;  %v779_v50 = vshrl.u32 %v761_v30, %v777_v18  ;;  %v456_v36 = vshll.u32 %v4069_v37, 30  ;;  %v2972_v15 = vadd.s32 4294967294, %v981_v48  ;;  %1957 = vperm.xlu1 %3196, %v58_v23  }
  0xf9   :  { %v637_v34 = vsel %vm633_vm6, %v617_v1, %v620_v26  ;;  %v4088_v39 = vmul.u32.u64.low %v649_v55, %v648_v4  ;;  %v4089_v47 = vmul.u32.u64.high %v649_v55, %v648_v4, %v4088_v39  ;;  %v639_v46 = vsel %vm635_vm4, %v623_v52, %v638_v44 }
  0xfa   :  { %v4094_v12 = vsub.s32 %v453_v19, %v456_v36  ;;  %v4098_v16 = vmul.u32.u64.low %v649_v55, %v644_v17  ;;  %v4099_v21 = vmul.u32.u64.high %v649_v55, %v644_v17, %v4098_v16  ;;  %v784_v30 = vor.u32 4788187, %v783_v22  ;;  %v59_v22 = vld [vmem:[%s5159_s3 + $0x18] sm:$0xff] }
  0xfb   :  { %v881_v26 = vsub.s32 32, %v4047_v53  ;;  %v886_v56 = vadd.s32 127, %v885_v20  ;;  %v1080_v27 = vshll.u32 %v4075_v43, 30  ;;  %v4107_v14 = vsel %vm532_vm5, %v3799_v0, 920167782 }
  0xfc   :  { %v4111_v19 = vor.u32 %v4014_v58, %v3996_v13  ;;  %vm324_vm8 = vcmp.lt.s32.totalorder %v3829_v61, 4  ;;  %v459_v52 = vsub.s32 0, %v4094_v12  ;;  %v320_v18 = vor.u32 %v319_v24, %v4018_v57  ;;  %v57_v13 = vld [vmem:[%s5159_s3 + $0x8] sm:$0xff]  ;;  %1962 = vperm.xlu1 %3196, %v59_v22   ;;  %v60_v24 = vld [vmem:[%s5159_s3 + $0x20] sm:$0xff] }
  0xfd   :  { %v780_v10 = vor.u32 %v779_v50, %v778_v51  ;;  %v865_v9 = vadd.s32 %v3727_v32, %v3734_v49  ;;  %v640_v7 = vsel %vm634_vm7, %v637_v34, %v639_v46  ;;  %vm2973_vm9 = vcmp.lt.s32.totalorder %v2972_v15, 0  ;;  %1952 = vperm.xlu0 %3197, %v57_v13   ;;  %v5233_v46 = vld [vmem:[#allocation9_spill] sm:$0xff] }
  0xfe   :  { %v2951_v58 = vmin.u32 %v459_v52, %v4094_v12  ;;  %vm658_vm10 = vc.u32 %v4089_v47, %v4098_v16  ;;  %v659_v57 = vadd.s32 1, %v4099_v21  ;;  %v785_v54 = vand.u32 2147483647, %v784_v30 }
  0xff   :  { %v883_v32 = vshrl.u32 %v865_v9, %v881_v26  ;;  %v887_v49 = vshll.u32 %v886_v56, 23  ;;  %v4131_v48 = vsub.s32 %v4036_v59, %v1080_v27  ;;  %v5232_v45 = vor.u32 %v3767_v3, %v3633_v28  ;;  %v61_v3 = vld [vmem:[%s5159_s3 + $0x28] sm:$0xff]  ;;  %v63_v56 = vld [vmem:[%s5159_s3 + $0x38] sm:$0xff]  ;;  %v62_v27 = vld [vmem:[%s5159_s3 + $0x30] sm:$0xff] }
 0x100   :  { %v4143_v20 = vsel %vm324_vm8, %v4111_v19, 920167782  ;;  %v461_v1 = vclz %v2951_v58  ;;  %v656_v4 = vmul.u32 %v649_v55, %v640_v7  ;;  %v787_v44 = vcvt.s32.f32 %v780_v10  ;;  %1972 = vperm.xlu1 %3196, %v61_v3  }
 0x101   :  { %v4138_v40 = vsel %vm532_vm5, %v5232_v45, 1326507024  ;;  %v882_v17 = vshll.u32 %v3884_v42, %v4047_v53  ;;  %v4148_v59 = vsel %vm2973_vm9, 0, %v2972_v15  ;;  %v660_v28 = vsel %vm658_vm10, %v659_v57, %v4099_v21  ;;  %1967 = vperm.xlu0 %3197, %v60_v24   ;;  %v5234_v57 = vld [vmem:[#allocation8_spill] sm:$0xff] }
 0x102   :  { %v4159_v55 = vsel %vm324_vm8, %v320_v18, 1326507024  ;;  %v4163_v42 = vadd.s32 %v3823_v25, %v3821_v41  ;;  %v2952_v53 = vadd.s32 4294967294, %v461_v1  ;;  %v661_v51 = vadd.s32 %v660_v28, %v656_v4 }
 0x103   :  { %v4165_v50 = vmul.f32 %v787_v44, %v785_v54  ;;  %v4167_v36 = vor.u32 %v883_v32, %v882_v17  ;;  %v4169_v15 = vor.u32 4788187, %v887_v49  ;;  %v1083_v34 = vsub.s32 0, %v4131_v48  ;;  %v65_v44 = vld [vmem:[%s5159_s3 + $0x48] sm:$0xff] }
 0x104   :  { %v989_v39 = vsub.s32 4294967266, %v4148_v59  ;;  %vm2953_vm11 = vcmp.lt.s32.totalorder %v2952_v53, 0  ;;  %v662_v23 = vadd.s32 536870912, %v661_v51  ;;  %v289_v21 = vand.u32 2147483647, %v5233_v46  ;;  %1982 = vperm.xlu1 %3196, %v63_v56   ;;  %v67_v56 = vld [vmem:[%s5159_s3 + $0x58] sm:$0xff] }
 0x105   :  { %v464_v41 = vsel %vm2953_vm11, 0, %v2952_v53  ;;  %v307_v25 = vshrl.u32 %v5228_v63, %v3864_v33  ;;  %v310_v30 = vshrl.u32 %v5229_v8, %v3864_v33  ;;  %v313_v26 = vshrl.u32 %v5226_v62, %v3864_v33  ;;  %1977 = vperm.xlu0 %3197, %v62_v27   ;;  %v66_v27 = vld [vmem:[%s5159_s3 + $0x50] sm:$0xff] }
 0x106   :  { %v449_v52 = vadd.s32 %v4008_v38, %v3989_v35  ;;  %v465_v18 = vsub.s32 32, %v464_v41  ;;  %v469_v10 = vsub.s32 4294967266, %v464_v41  ;;  %v4188_v9 = vshrl.u32 %v662_v23, 30 }
 0x107   :  { %v2975_v7 = vmin.u32 %v1083_v34, %v4131_v48  ;;  %v306_v22 = vshll.u32 %v5224_v6, %v3836_v2  ;;  %v309_v13 = vshll.u32 %v5228_v63, %v3836_v2  ;;  %v312_v58 = vshll.u32 %v5229_v8, %v3836_v2  ;;  %v64_v2 = vld [vmem:[%s5159_s3 + $0x40] sm:$0xff] }
 0x108   :  { %vm395_vm12 = vcmp.lt.s32.totalorder %v5234_v57, 0  ;;  %v466_v35 = vshll.u32 %v4094_v12, %v464_v41  ;;  %v467_v38 = vshrl.u32 %v449_v52, %v465_v18  ;;  %v470_v54 = vadd.s32 127, %v469_v10  ;;  %1992 = vperm.xlu1 %3196, %v65_v44  }
 0x109   :  { %v664_v32 = vshll.u32 %v4188_v9, 30  ;;  %v296_v49 = vand.u32 8388607, %v289_v21  ;;  %v308_v45 = vor.u32 %v307_v25, %v306_v22  ;;  %v311_v1 = vor.u32 %v310_v30, %v309_v13  ;;  %1987 = vperm.xlu0 %3197, %v64_v2   ;;  %v68_v2 = vld [vmem:[%s5159_s3 + $0x60] sm:$0xff] }
 0x10a   :  { %v314_v4 = vor.u32 %v313_v26, %v312_v58  ;;  %v990_v17 = vadd.s32 127, %v989_v39  ;;  %v468_v12 = vor.u32 %v467_v38, %v466_v35  ;;  %v471_v28 = vshll.u32 %v470_v54, 23 }
 0x10b   :  { %v4208_v3 = vsub.s32 %v661_v51, %v664_v32  ;;  %v891_v24 = vcvt.s32.f32 %v4167_v36  ;;  %v985_v53 = vsub.s32 32, %v4148_v59  ;;  %v4214_v34 = vadd.s32 %v3938_v11, %v3944_v5 }
 0x10c   :  { %v1085_v23 = vclz %v2975_v7  ;;  %v5235_v41 = vand.u32 2147483647, %v5234_v57  ;;  %v472_v39 = vor.u32 4788187, %v471_v28  ;;  %vm321_vm14 = vcmp.lt.s32.totalorder %v3829_v61, 1  ;;  %2002 = vperm.xlu1 %3196, %v67_v56  }
 0x10d   :  { %v667_v51 = vsub.s32 0, %v4208_v3  ;;  %vm323_vm15 = vcmp.lt.s32.totalorder %v3829_v61, 3  ;;  %v479_v30 = vsub.s32 4, %v4069_v37  ;;  %v297_v26 = vor.u32 8388608, %v296_v49  ;;  %1997 = vperm.xlu0 %3197, %v66_v27  }
 0x10e   :  { %vm4218_vm13 = vcmp.le.f32.partialorder %v5235_v41, 0.7853982  ;;  %v329_v5 = vsel %vm321_vm14, %v308_v45, %v311_v1  ;;  %v331_v11 = vsel %vm323_vm15, %v314_v4, %v4143_v20  ;;  %v991_v52 = vshll.u32 %v990_v17, 23  ;;  %v71_v41 = vld [vmem:[%s5159_s3 + $0x78] sm:$0xff] }
 0x10f   :  { %v473_v18 = vand.u32 2147483647, %v472_v39  ;;  %v475_v10 = vcvt.s32.f32 %v468_v12  ;;  %v2959_v7 = vmin.u32 %v667_v51, %v4208_v3  ;;  %v305_v22 = vshrl.u32 %v5224_v6, %v3864_v33 }
 0x110   :  { %vm322_vm0 = vcmp.lt.s32.totalorder %v3829_v61, 2  ;;  %v326_v20 = vsel %vm324_vm8, %v314_v4, 2102212464  ;;  %v333_v13 = vsel %vm321_vm14, %v311_v1, %v314_v4  ;;  %v2976_v58 = vadd.s32 4294967294, %v1085_v23  ;;  %v69_v4 = vld [vmem:[%s5159_s3 + $0x68] sm:$0xff] }
 0x111   :  { %v476_v35 = vmul.f32 %v475_v10, %v473_v18  ;;  %v669_v38 = vclz %v2959_v7  ;;  %v332_v54 = vsel %vm322_vm0, %v329_v5, %v331_v11  ;;  %v480_v32 = vsel %vm395_vm12, %v479_v30, %v4069_v37  ;;  %2012 = vperm.xlu1 %3196, %v69_v4   ;;  %2007 = vperm.xlu0 %3197, %v68_v2  }
 0x112   :  { %v325_v33 = vsel %vm321_vm14, %v305_v22, %v308_v45  ;;  %v335_v49 = vsel %vm323_vm15, %v4111_v19, %v4159_v55  ;;  %v337_v44 = vshll.u32 %v297_v26, 8  ;;  %v327_v37 = vsel %vm323_vm15, %v311_v1, %v326_v20  ;;  %v70_v1 = vld [vmem:[%s5159_s3 + $0x70] sm:$0xff] }
 0x113   :  { %v477_v17 = vxor.u32 2147483648, %v476_v35  ;;  %v2960_v12 = vadd.s32 4294967294, %v669_v38  ;;  %v336_v45 = vsel %vm322_vm0, %v333_v13, %v335_v49  ;;  %v986_v39 = vshll.u32 %v3963_v29, %v4148_v59  ;;  %v5238_v13 = vld [vmem:[#allocation6_spill] sm:$0xff] }
 0x114   :  { %v4266_v19 = vmul.u32.u64.low %v337_v44, %v336_v45  ;;  %v4267_v55 = vmul.u32.u64.high %v337_v44, %v336_v45, %v4266_v19  ;;  %v4269_v28 = vmul.u32.u64.low %v337_v44, %v332_v54  ;;  %v4270_v23 = vmul.u32.u64.high %v337_v44, %v332_v54, %v4269_v28  ;;  %v5240_v54 = vld [vmem:[#allocation7_spill] sm:$0xff] }
 0x115   :  { %vm2977_vm1 = vcmp.lt.s32.totalorder %v2976_v58, 0  ;;  %v4283_v51 = vsel %vm4218_vm13, 0, %v480_v32  ;;  %vm2961_vm2 = vcmp.lt.s32.totalorder %v2960_v12, 0  ;;  %v987_v30 = vshrl.u32 %v4163_v42, %v985_v53  ;;  %2022 = vperm.xlu1 %3196, %v71_v41   ;;  %2017 = vperm.xlu0 %3197, %v70_v1   ;;  %v89_v53 = vld [vmem:[%s5161_s5 + $0x8] sm:$0xff] }
 0x116   :  { %v4286_v26 = vor.u32 4788187, %v991_v52  ;;  %v672_v5 = vsel %vm2961_vm2, 0, %v2960_v12  ;;  %v328_v11 = vsel %vm322_vm0, %v325_v33, %v327_v37  ;;  %v478_v56 = vsel %vm395_vm12, %v477_v17, %v476_v35  ;;  %v5239_v35 = vld [vmem:[#allocation13_spill] sm:$0xff]  ;;  %v91_v12 = vld [vmem:[%s5161_s5 + $0x18] sm:$0xff]  ;;  %v90_v37 = vld [vmem:[%s5161_s5 + $0x10] sm:$0xff] }
 0x117   :  { %v657_v29 = vadd.s32 %v4098_v16, %v4089_v47  ;;  %v673_v59 = vsub.s32 32, %v672_v5  ;;  %v677_v27 = vsub.s32 4294967266, %v672_v5  ;;  %v4294_v18 = vsel %vm2977_vm1, 0, %v2976_v58  ;;  %v88_v47 = vld [vmem:[%s5161_s5] sm:$0xff]  ;;  %v97_v19 = vld [vmem:[%s5161_s5 + $0x48] sm:$0xff] }
 0x118   :  { %v486_v42 = vadd.s32 3, %v4283_v51  ;;  %vm346_vm3 = vc.u32 %v4267_v55, %v4269_v28  ;;  %v347_v61 = vadd.s32 1, %v4270_v23  ;;  %v674_v16 = vshll.u32 %v4208_v3, %v672_v5 }
 0x119   :  { %v675_v52 = vshrl.u32 %v657_v29, %v673_v59  ;;  %v678_v10 = vadd.s32 127, %v677_v27  ;;  %v344_v7 = vmul.u32 %v337_v44, %v328_v11  ;;  %v481_v22 = vsel %vm4218_vm13, %v5234_v57, %v478_v56  ;;  %2274 = vperm.xlu1 %3196, %v89_v53   ;;  %2269 = vperm.xlu0 %3197, %v88_v47   ;;  %v5241_v44 = vld [vmem:[#allocation12_spill] sm:$0xff]  ;;  %v93_v47 = vld [vmem:[%s5161_s5 + $0x28] sm:$0xff] }
 0x11a   :  { %v348_v20 = vsel %vm346_vm3, %v347_v61, %v4270_v23  ;;  %v497_v58 = vand.u32 2147483647, %v5238_v13  ;;  %v515_v38 = vshrl.u32 %v5228_v63, %v5239_v35  ;;  %vm603_vm4 = vcmp.lt.s32.totalorder %v5240_v54, 0 }
 0x11b   :  { %v676_v32 = vor.u32 %v675_v52, %v674_v16  ;;  %v679_v33 = vshll.u32 %v678_v10, 23  ;;  %v349_v49 = vadd.s32 %v348_v20, %v344_v7  ;;  %v518_v3 = vshrl.u32 %v5229_v8, %v5239_v35  ;;  %v92_v16 = vld [vmem:[%s5161_s5 + $0x20] sm:$0xff] }
 0x11c   :  { %v1093_v25 = vsub.s32 4294967266, %v4294_v18  ;;  %v517_v4 = vshll.u32 %v5228_v63, %v5241_v44  ;;  %v520_v2 = vshll.u32 %v5229_v8, %v5241_v44  ;;  %v521_v17 = vshrl.u32 %v5226_v62, %v5239_v35 }
 0x11d   :  { %3198 = vcosq.f32 %v481_v22  ;;  %v5242_v45 = vand.u32 2147483647, %v5240_v54  ;;  %v680_v63 = vor.u32 4788187, %v679_v33  ;;  %v350_v8 = vadd.s32 536870912, %v349_v49  ;;  %2284 = vperm.xlu1 %3196, %v91_v12   ;;  %2279 = vperm.xlu0 %3197, %v90_v37  }
 0x11e   :  { %v514_v62 = vshll.u32 %v5224_v6, %v5241_v44  ;;  %3200 = vsinq.f32 %v481_v22  ;;  %v504_v23 = vand.u32 8388607, %v497_v58  ;;  %v519_v41 = vor.u32 %v518_v3, %v517_v4 }
 0x11f   :  { %vm4332_vm6 = vcmp.le.f32.partialorder %v5242_v45, 0.7853982  ;;  %v522_v1 = vor.u32 %v521_v17, %v520_v2  ;;  %v681_v5 = vand.u32 2147483647, %v680_v63  ;;  %v683_v11 = vcvt.s32.f32 %v676_v32 }
 0x120   :  { %v4340_v56 = vshrl.u32 %v350_v8, 30  ;;  %v516_v29 = vor.u32 %v515_v38, %v514_v62  ;;  %v4342_v59 = vor.u32 %v987_v30, %v986_v39  ;;  %v1089_v27 = vsub.s32 32, %v4294_v18 }
 0x121   :  { %v1094_v61 = vadd.s32 127, %v1093_v25  ;;  %v687_v53 = vsub.s32 4, %v4188_v9  ;;  %v684_v52 = vmul.f32 %v683_v11, %v681_v5  ;;  %vm529_vm7 = vcmp.lt.s32.totalorder %v3610_v31, 1  ;;  %2294 = vperm.xlu1 %3196, %v93_v47   ;;  %2289 = vperm.xlu0 %3197, %v92_v16  }
 0x122   :  { %v352_v10 = vshll.u32 %v4340_v56, 30  ;;  %vm531_vm8 = vcmp.lt.s32.totalorder %v3610_v31, 3  ;;  %v4355_v39 = vand.u32 3, %v486_v42  ;;  %v505_v30 = vor.u32 8388608, %v504_v23  ;;  %v96_v23 = vld [vmem:[%s5161_s5 + $0x40] sm:$0xff] }
 0x123   :  { %v541_v7 = vsel %vm529_vm7, %v519_v41, %v522_v1  ;;  %v543_v22 = vsel %vm531_vm8, %v3799_v0, %v4138_v40  ;;  %v685_v20 = vxor.u32 2147483648, %v684_v52  ;;  %v537_v32 = vsel %vm529_vm7, %v516_v29, %v519_v41  ;;  %v95_v40 = vld [vmem:[%s5161_s5 + $0x38] sm:$0xff] }
 0x124   :  { %v4363_v38 = vsub.s32 %v349_v49, %v352_v10  ;;  %v539_v42 = vsel %vm531_vm8, %v522_v1, %v4107_v14  ;;  %v1095_v33 = vshll.u32 %v1094_v61, 23  ;;  %v688_v3 = vsel %vm603_vm4, %v687_v53, %v4188_v9  ;;  %v94_v14 = vld [vmem:[%s5161_s5 + $0x30] sm:$0xff] }
 0x125   :  { %v513_v0 = vshrl.u32 %v5224_v6, %v5239_v35  ;;  %vm530_vm9 = vcmp.lt.s32.totalorder %v3610_v31, 2  ;;  %v686_v49 = vsel %vm603_vm4, %v685_v20, %v684_v52  ;;  %v534_v9 = vsel %vm532_vm5, %v522_v1, 2102212464  ;;  %2304 = vperm.xlu1 %3196, %v95_v40   ;;  %2299 = vperm.xlu0 %3197, %v94_v14   ;;  %v98_v31 = vld [vmem:[%s5161_s5 + $0x50] sm:$0xff] }
 0x126   :  { %v355_v25 = vsub.s32 0, %v4363_v38  ;;  %v544_v6 = vsel %vm530_vm9, %v541_v7, %v543_v22  ;;  %v1091_v35 = vshrl.u32 %v4214_v34, %v1089_v27  ;;  %v689_v44 = vsel %vm4332_vm6, %v5240_v54, %v686_v49  ;;  %v101_v49 = vld [vmem:[%s5161_s5 + $0x68] sm:$0xff] }
 0x127   :  { %v540_v4 = vsel %vm530_vm9, %v537_v32, %v539_v42  ;;  %v545_v2 = vshll.u32 %v505_v30, 8  ;;  %v4395_v17 = vpop.eup %3198  ;;  %v4399_v12 = vsel %vm4332_vm6, 0, %v688_v3  ;;  %3202 = vcosq.f32 %v689_v44 }
 0x128   :  { %v2947_v37 = vmin.u32 %v355_v25, %v4363_v38  ;;  %v533_v34 = vsel %vm529_vm7, %v513_v0, %v516_v29  ;;  %v4404_v45 = vpop.eup %3200  ;;  %3204 = vsinq.f32 %v689_v44  ;;  %v535_v63 = vsel %vm531_vm8, %v519_v41, %v534_v9  ;;  %v100_v25 = vld [vmem:[%s5161_s5 + $0x60] sm:$0xff] }
 0x129   :  { %v4408_v8 = vmul.u32.u64.low %v545_v2, %v544_v6  ;;  %v4409_v62 = vmul.u32.u64.high %v545_v2, %v544_v6, %v4408_v8  ;;  %v1096_v1 = vor.u32 4788187, %v1095_v33  ;;  %v889_v27 = vand.u32 2147483647, %v4169_v15  ;;  %2314 = vperm.xlu1 %3196, %v97_v19   ;;  %2309 = vperm.xlu0 %3197, %v96_v23   ;;  %v103_v19 = vld [vmem:[%s5161_s5 + $0x78] sm:$0xff]  ;;  %v102_v23 = vld [vmem:[%s5161_s5 + $0x70] sm:$0xff] }
 0x12a   :  { %v357_v5 = vclz %v2947_v37  ;;  %v4417_v11 = vmul.u32.u64.low %v545_v2, %v540_v4  ;;  %v4418_v29 = vmul.u32.u64.high %v545_v2, %v540_v4, %v4417_v11  ;;  %v995_v41 = vcvt.s32.f32 %v4342_v59 }
 0x12b   :  { %v493_v61 = vxor.u32 2147483648, %v4395_v17  ;;  %v694_v53 = vadd.s32 3, %v4399_v12  ;;  %v1090_v47 = vshll.u32 %v4131_v48, %v4294_v18  ;;  %v490_v16 = vxor.u32 2147483648, %v4404_v45  ;;  %v99_v48 = vld [vmem:[%s5161_s5 + $0x58] sm:$0xff] }
 0x12c   :  { %v2948_v52 = vadd.s32 4294967294, %v357_v5  ;;  %v536_v10 = vsel %vm530_vm9, %v533_v34, %v535_v63  ;;  %v993_v30 = vand.u32 2147483647, %v4286_v26  ;;  %vm489_vm5 = vcmp.eq.s32.totalorder %v4355_v39, 0 }
 0x12d   :  { %vm492_vm10 = vcmp.eq.s32.totalorder %v4355_v39, 2  ;;  %vm554_vm11 = vc.u32 %v4409_v62, %v4417_v11  ;;  %v1092_v15 = vor.u32 %v1091_v35, %v1090_v47  ;;  %v1097_v18 = vand.u32 2147483647, %v1096_v1  ;;  %2324 = vperm.xlu1 %3196, %v99_v48   ;;  %2319 = vperm.xlu0 %3197, %v98_v31   ;;  %v121_v31 = vld [vmem:[%s5163_s7 + $0x8] sm:$0xff] }
 0x12e   :  { %vm2949_vm12 = vcmp.lt.s32.totalorder %v2948_v52, 0  ;;  %v555_v26 = vadd.s32 1, %v4418_v29  ;;  %v494_v59 = vsel %vm492_vm10, %v493_v61, %v4404_v45  ;;  %v695_v7 = vand.u32 3, %v694_v53 }
 0x12f   :  { %v360_v22 = vsel %vm2949_vm12, 0, %v2948_v52  ;;  %v552_v20 = vmul.u32 %v545_v2, %v536_v10  ;;  %v491_v32 = vsel %vm489_vm5, %v4395_v17, %v490_v16  ;;  %v892_v0 = vmul.f32 %v891_v24, %v889_v27 }
 0x130   :  { %v361_v42 = vsub.s32 32, %v360_v22  ;;  %v365_v33 = vsub.s32 4294967266, %v360_v22  ;;  %v556_v3 = vsel %vm554_vm11, %v555_v26, %v4418_v29  ;;  %vm485_vm13 = vweird.f32 %v5234_v57 }
 0x131   :  { %v345_v40 = vadd.s32 %v4269_v28, %v4267_v55  ;;  %v557_v14 = vadd.s32 %v556_v3, %v552_v20  ;;  %v4460_v9 = vpop.eup %3202  ;;  %v996_v6 = vmul.f32 %v995_v41, %v993_v30  ;;  %v1099_v35 = vcvt.s32.f32 %v1092_v15  ;;  %2334 = vperm.xlu1 %3196, %v101_v49   ;;  %2329 = vperm.xlu0 %3197, %v100_v25   ;;  %v120_v15 = vld [vmem:[%s5163_s7] sm:$0xff] }
 0x132   :  { %vm488_vm14 = vcmp.lt.s32.totalorder %v4355_v39, 2  ;;  %v366_v36 = vadd.s32 127, %v365_v33  ;;  %v4463_v24 = vpop.eup %3204  ;;  %v701_v55 = vxor.u32 2147483648, %v4460_v9  ;;  %vm700_vm15 = vcmp.eq.s32.totalorder %v695_v7, 2 }
 0x133   :  { %v495_v44 = vsel %vm488_vm14, %v491_v32, %v494_v59  ;;  %v363_v28 = vshrl.u32 %v345_v40, %v361_v42  ;;  %v558_v4 = vadd.s32 536870912, %v557_v14  ;;  %v1100_v2 = vmul.f32 %v1099_v35, %v1097_v18  ;;  %v5245_v59 = vld [vmem:[#allocation10_spill] sm:$0xff]  ;;  %v5247_v42 = vld [vmem:[#allocation15_spill] sm:$0xff] }
 0x134   :  { %v698_v37 = vxor.u32 2147483648, %v4463_v24  ;;  %v367_v34 = vshll.u32 %v366_v36, 23  ;;  %vm697_vm0 = vcmp.eq.s32.totalorder %v695_v7, 0  ;;  %v702_v39 = vsel %vm700_vm15, %v701_v55, %v4463_v24  ;;  %v5248_v40 = vld [vmem:[#allocation14_spill] sm:$0xff] }
 0x135   :  { %v362_v63 = vshll.u32 %v4363_v38, %v360_v22  ;;  %v4471_v8 = vshrl.u32 %v558_v4, 30  ;;  %v496_v1 = vsel %vm485_vm13, nan, %v495_v44  ;;  %vm696_vm1 = vcmp.lt.s32.totalorder %v695_v7, 2  ;;  %2344 = vperm.xlu1 %3196, %v103_v19   ;;  %2339 = vperm.xlu0 %3197, %v102_v23   ;;  %v5246_v7 = vld [vmem:[#allocation11_spill] sm:$0xff] }
 0x136   :  { %v699_v5 = vsel %vm697_vm0, %v4460_v9, %v698_v37  ;;  %v368_v29 = vor.u32 4788187, %v367_v34  ;;  %vm693_vm2 = vweird.f32 %v5240_v54  ;;  %v893_v53 = vxor.u32 2147483648, %v892_v0 }
 0x137   :  { %v703_v38 = vsel %vm696_vm1, %v699_v5, %v702_v39  ;;  %v364_v27 = vor.u32 %v363_v28, %v362_v63  ;;  %v560_v41 = vshll.u32 %v4471_v8, 30  ;;  %v1101_v52 = vxor.u32 2147483648, %v1100_v2  ;;  %v125_v5 = vld [vmem:[%s5163_s7 + $0x28] sm:$0xff] }
 0x138   :  { %v704_v47 = vsel %vm693_vm2, nan, %v703_v38  ;;  %v369_v30 = vand.u32 2147483647, %v368_v29  ;;  %v789_v18 = vxor.u32 2147483648, %v4165_v50  ;;  %v997_v26 = vxor.u32 2147483648, %v996_v6 }
 0x139   :  { %v3026_v10 = vpack.c.bf16 %v704_v47, %v496_v1  ;;  %v4488_v48 = vsub.s32 %v557_v14, %v560_v41  ;;  %vm707_vm3 = vcmp.lt.s32.totalorder %v5245_v59, 0  ;;  %vm811_vm4 = vcmp.lt.s32.totalorder %v5246_v7, 0  ;;  %2547 = vperm.xlu1 %3196, %v121_v31   ;;  %2542 = vperm.xlu0 %3197, %v120_v15  }
 0x13a   :  { %v371_v22 = vcvt.s32.f32 %v364_v27  ;;  %v894_v32 = vsel %vm811_vm4, %v893_v53, %v892_v0  ;;  %vm1019_vm6 = vcmp.lt.s32.totalorder %v5247_v42, 0  ;;  %v1317_v33 = vand.u32 3, %v4283_v51  ;;  %v123_v0 = vld [vmem:[%s5163_s7 + $0x18] sm:$0xff]  ;;  %v122_v51 = vld [vmem:[%s5163_s7 + $0x10] sm:$0xff] }
 0x13b   :  { %3027 = vmatprep.subr.bf16.mxu0 %v3026_v10  ;;  %3138 = vmatprep.subr.bf16.mxu1 %v3026_v10  ;;  %v563_v20 = vsub.s32 0, %v4488_v48  ;;  %v375_v3 = vsub.s32 4, %v4340_v56  ;;  %vm915_vm7 = vcmp.lt.s32.totalorder %v5248_v40, 0  ;;  %v1102_v14 = vsel %vm1019_vm6, %v1101_v52, %v1100_v2  ;;  %v127_v52 = vld [vmem:[%s5163_s7 + $0x38] sm:$0xff] }
 0x13c   :  { %v372_v49 = vmul.f32 %v371_v22, %v369_v30  ;;  %v4518_v35 = vsel %vm707_vm3, %v789_v18, %v4165_v50  ;;  %v4522_v36 = vsel %vm915_vm7, %v997_v26, %v996_v6  ;;  %vm291_vm8 = vcmp.lt.s32.totalorder %v5233_v46, 0 }
 0x13d   :  { %v2955_v25 = vmin.u32 %v563_v20, %v4488_v48  ;;  %v5249_v44 = vand.u32 2147483647, %v5246_v7  ;;  %vm4533_vm5 = vcmp.le.f32.partialorder %v289_v21, 0.7853982  ;;  %v5254_v2 = vand.u32 2147483647, %v5247_v42  ;;  %2557 = vperm.xlu1 %3196, %v123_v0   ;;  %2552 = vperm.xlu0 %3197, %v122_v51  }
 0x13e   :  { %vm1318_vm11 = vcmp.lt.s32.totalorder %v1317_v33, 2  ;;  %v376_v39 = vsel %vm291_vm8, %v375_v3, %v4340_v56  ;;  %v5257_v21 = vld [vmem:[#allocation17_spill] sm:$0xff]  ;;  %vm1319_vm12 = vcmp.eq.s32.totalorder %v1317_v33, 0  ;;  %vm1322_vm14 = vcmp.eq.s32.totalorder %v1317_v33, 2  ;;  %v124_v56 = vld [vmem:[%s5163_s7 + $0x20] sm:$0xff] }
 0x13f   :  { %vm4527_vm9 = vcmp.le.f32.partialorder %v5249_v44, 0.7853982  ;;  %v565_v50 = vclz %v2955_v25  ;;  %vm4542_vm10 = vcmp.le.f32.partialorder %v5254_v2, 0.7853982  ;;  %v895_v63 = vsub.s32 4, %v5257_v21  ;;  %v5263_v51 = vld [vmem:[#allocation16_spill] sm:$0xff] }
 0x140   :  { %v897_v6 = vsel %vm4527_vm9, %v5246_v7, %v894_v32  ;;  %v1105_v19 = vsel %vm4542_vm10, %v5247_v42, %v1102_v14  ;;  %v373_v23 = vxor.u32 2147483648, %v372_v49  ;;  %v1324_v29 = vsel %vm1322_vm14, %v493_v61, %v4404_v45  ;;  %v129_v14 = vld [vmem:[%s5163_s7 + $0x48] sm:$0xff] }
 0x141   :  { %v2956_v1 = vadd.s32 4294967294, %v565_v50  ;;  %v4563_v38 = vand.u32 3, %v4399_v12  ;;  %3206 = vcosq.f32 %v897_v6  ;;  %v1103_v27 = vsub.s32 4, %v4075_v43  ;;  %2567 = vperm.xlu1 %3196, %v125_v5   ;;  %2562 = vperm.xlu0 %3197, %v124_v56  }
 0x142   :  { %v1321_v41 = vsel %vm1319_vm12, %v4395_v17, %v490_v16  ;;  %v4571_v53 = vsel %vm4533_vm5, 0, %v376_v39  ;;  %3208 = vcosq.f32 %v1105_v19  ;;  %v553_v47 = vadd.s32 %v4417_v11, %v4409_v62  ;;  %v126_v62 = vld [vmem:[%s5163_s7 + $0x30] sm:$0xff] }
 0x143   :  { %vm2957_vm15 = vcmp.lt.s32.totalorder %v2956_v1, 0  ;;  %v896_v12 = vsel %vm811_vm4, %v895_v63, %v5257_v21  ;;  %3210 = vsinq.f32 %v1105_v19  ;;  %v374_v17 = vsel %vm291_vm8, %v373_v23, %v372_v49  ;;  %v128_v49 = vld [vmem:[%s5163_s7 + $0x40] sm:$0xff]  ;;  %v131_v23 = vld [vmem:[%s5163_s7 + $0x58] sm:$0xff] }
 0x144   :  { %v568_v61 = vsel %vm2957_vm15, 0, %v2956_v1  ;;  %3212 = vsinq.f32 %v897_v6  ;;  %vm1525_vm0 = vcmp.eq.s32.totalorder %v4563_v38, 0  ;;  %vm1528_vm1 = vcmp.eq.s32.totalorder %v4563_v38, 2 }
 0x145   :  { %v569_v45 = vsub.s32 32, %v568_v61  ;;  %v573_v16 = vsub.s32 4294967266, %v568_v61  ;;  %vm4590_vm4 = vcmp.le.f32.partialorder %v497_v58, 0.7853982  ;;  %v583_v10 = vsub.s32 4, %v4471_v8  ;;  %2577 = vperm.xlu1 %3196, %v127_v52   ;;  %2572 = vperm.xlu0 %3197, %v126_v62   ;;  %v132_v52 = vld [vmem:[%s5163_s7 + $0x60] sm:$0xff] }
 0x146   :  { %v1104_v30 = vsel %vm1019_vm6, %v1103_v27, %v4075_v43  ;;  %v570_v31 = vshll.u32 %v4488_v48, %v568_v61  ;;  %v4601_v26 = vsel %vm4527_vm9, 0, %v896_v12  ;;  %v1325_v22 = vsel %vm1318_vm11, %v1321_v41, %v1324_v29 }
 0x147   :  { %v571_v15 = vshrl.u32 %v553_v47, %v569_v45  ;;  %v574_v18 = vadd.s32 127, %v573_v16  ;;  %v377_v58 = vsel %vm4533_vm5, %v5233_v46, %v374_v17  ;;  %v382_v20 = vadd.s32 3, %v4571_v53 }
 0x148   :  { %vm499_vm8 = vcmp.lt.s32.totalorder %v5238_v13, 0  ;;  %vm1524_vm6 = vcmp.lt.s32.totalorder %v4563_v38, 2  ;;  %v4612_v32 = vsel %vm4542_vm10, 0, %v1104_v30  ;;  %v5260_v33 = vand.u32 2147483647, %v5248_v40 }
 0x149   :  { %v572_v43 = vor.u32 %v571_v15, %v570_v31  ;;  %v575_v48 = vshll.u32 %v574_v18, 23  ;;  %v584_v25 = vsel %vm499_vm8, %v583_v10, %v4471_v8  ;;  %v902_v0 = vadd.s32 3, %v4601_v26  ;;  %2587 = vperm.xlu1 %3196, %v129_v14   ;;  %2582 = vperm.xlu0 %3197, %v128_v49  }
 0x14a   :  { %vm4616_vm9 = vcmp.le.f32.partialorder %v5260_v33, 0.7853982  ;;  %v791_v44 = vsub.s32 4, %v5263_v51  ;;  %v4637_v4 = vsel %vm485_vm13, nan, %v1325_v22  ;;  %3214 = vcosq.f32 %v377_v58 }
 0x14b   :  { %v1001_v28 = vsel %vm4616_vm9, %v5248_v40, %v4522_v36  ;;  %v576_v50 = vor.u32 4788187, %v575_v48  ;;  %v5264_v6 = vand.u32 2147483647, %v5245_v59  ;;  %v4645_v8 = vpop.eup %3206  ;;  %3216 = vsinq.f32 %v377_v58 }
 0x14c   :  { %v1110_v34 = vadd.s32 3, %v4612_v32  ;;  %v999_v36 = vsub.s32 4, %v3913_v60  ;;  %v4653_v39 = vpop.eup %3208  ;;  %v579_v63 = vcvt.s32.f32 %v572_v43  ;;  %v4657_v19 = vsel %vm4590_vm4, 0, %v584_v25  ;;  %v134_v43 = vld [vmem:[%s5163_s7 + $0x70] sm:$0xff] }
 0x14d   :  { %vm4641_vm5 = vcmp.le.f32.partialorder %v5264_v6, 0.7853982  ;;  %v577_v21 = vand.u32 2147483647, %v576_v50  ;;  %3218 = vcosq.f32 %v1001_v28  ;;  %v4665_v1 = vpop.eup %3210  ;;  %v4667_v5 = vand.u32 3, %v382_v20  ;;  %2597 = vperm.xlu1 %3196, %v131_v23   ;;  %v135_v20 = vld [vmem:[%s5163_s7 + $0x78] sm:$0xff] }
 0x14e   :  { %v793_v57 = vsel %vm4641_vm5, %v5245_v59, %v4518_v35  ;;  %v130_v35 = vld [vmem:[%s5163_s7 + $0x50] sm:$0xff]  ;;  %v4669_v56 = vand.u32 3, %v902_v0  ;;  %v792_v29 = vsel %vm707_vm3, %v791_v44, %v5263_v51  ;;  %3220 = vsinq.f32 %v1001_v28  ;;  %v4674_v27 = vpop.eup %3212 }
 0x14f   :  { %v1527_v41 = vsel %vm1525_vm0, %v4460_v9, %v698_v37  ;;  %v1530_v47 = vsel %vm1528_vm1, %v701_v55, %v4463_v24  ;;  %v580_v61 = vmul.f32 %v579_v63, %v577_v21  ;;  %3222 = vcosq.f32 %v793_v57  ;;  %2592 = vperm.xlu0 %3197, %v130_v35   ;;  %v133_v55 = vld [vmem:[%s5163_s7 + $0x68] sm:$0xff] }
 0x150   :  { %v590_v12 = vadd.s32 3, %v4657_v19  ;;  %v1111_v17 = vand.u32 3, %v1110_v34  ;;  %3224 = vsinq.f32 %v793_v57  ;;  %v1000_v45 = vsel %vm915_vm7, %v999_v36, %v3913_v60  ;;  %v137_v57 = vld [vmem:[%s5165_s9] sm:$0x7] }
 0x151   :  { %v581_v16 = vxor.u32 2147483648, %v580_v61  ;;  %v1114_v37 = vxor.u32 2147483648, %v4665_v1  ;;  %v1117_v9 = vxor.u32 2147483648, %v4653_v39  ;;  %v4694_v24 = vsel %vm4641_vm5, 0, %v792_v29  ;;  %2607 = vperm.xlu1 %3196, %v133_v55  }
 0x152   :  { %v1531_v60 = vsel %vm1524_vm6, %v1527_v41, %v1530_v47  ;;  %v4705_v62 = vand.u32 3, %v4571_v53  ;;  %v906_v10 = vxor.u32 2147483648, %v4674_v27  ;;  %v909_v30 = vxor.u32 2147483648, %v4645_v8 }
 0x153   :  { %v582_v31 = vsel %vm499_vm8, %v581_v16, %v580_v61  ;;  %vm905_vm13 = vcmp.eq.s32.totalorder %v4669_v56, 0  ;;  %vm908_vm3 = vcmp.eq.s32.totalorder %v4669_v56, 2  ;;  %v4715_v15 = vsel %vm4616_vm9, 0, %v1000_v45  ;;  %2602 = vperm.xlu0 %3197, %v132_v52  }
 0x154   :  { %vm385_vm7 = vcmp.eq.s32.totalorder %v4667_v5, 0  ;;  %vm388_vm10 = vcmp.eq.s32.totalorder %v4667_v5, 2  ;;  %v585_v38 = vsel %vm4590_vm4, %v5238_v13, %v582_v31  ;;  %vm1113_vm11 = vcmp.eq.s32.totalorder %v1111_v17, 0  ;;  %v4723_v18 = vpop.eup %3214 }
 0x155   :  { %vm1116_vm12 = vcmp.eq.s32.totalorder %v1111_v17, 2  ;;  %v798_v53 = vadd.s32 3, %v4694_v24  ;;  %3226 = vcosq.f32 %v585_v38  ;;  %v4725_v22 = vand.u32 3, %v590_v12  ;;  %v3217_v48 = vpop.eup %3216  ;;  %2617 = vperm.xlu1 %3196, %v135_v20  }
 0x156   :  { %v1115_v58 = vsel %vm1113_vm11, %v4653_v39, %v1114_v37  ;;  %v1118_v11 = vsel %vm1116_vm12, %v1117_v9, %v4665_v1  ;;  %3228 = vsinq.f32 %v585_v38  ;;  %v907_v33 = vsel %vm905_vm13, %v4645_v8, %v906_v10 }
 0x157   :  { %v910_v3 = vsel %vm908_vm3, %v909_v30, %v4674_v27  ;;  %v1006_v14 = vadd.s32 3, %v4715_v15  ;;  %v4750_v49 = vpop.eup %3218  ;;  %vm384_vm14 = vcmp.lt.s32.totalorder %v4667_v5, 2  ;;  %vm1216_vm15 = vcmp.eq.s32.totalorder %v4705_v62, 0  ;;  %2612 = vperm.xlu0 %3197, %v134_v43  }
 0x158   :  { %vm1219_vm0 = vcmp.eq.s32.totalorder %v4705_v62, 2  ;;  %vm5210_vm1 = vweird.f32 %v5246_v7  ;;  %vm1112_vm4 = vcmp.lt.s32.totalorder %v1111_v17, 2  ;;  %v4756_v25 = vpop.eup %3220  ;;  %vm904_vm8 = vcmp.lt.s32.totalorder %v4669_v56, 2 }
 0x159   :  { %v1119_v0 = vsel %vm1112_vm4, %v1115_v58, %v1118_v11  ;;  %v4759_v51 = vand.u32 3, %v798_v53  ;;  %v4761_v44 = vpop.eup %3222  ;;  %v1532_v28 = vsel %vm693_vm2, nan, %v1531_v60  ;;  %v386_v50 = vxor.u32 2147483648, %v3217_v48 }
 0x15a   :  { %v389_v6 = vxor.u32 2147483648, %v4723_v18  ;;  %vm1215_vm6 = vcmp.lt.s32.totalorder %v4705_v62, 2  ;;  %v911_v2 = vsel %vm904_vm8, %v907_v33, %v910_v3  ;;  %v3463_v34 = vmov 0.0   ;;  %v4772_v36 = vpop.eup %3224 }
 0x15b   :  { %2138 = vmatprep.mubr.f32.mxu0 %v3463_v34  ;;  %2186 = vmatprep.mubr.f32.mxu1 %v3463_v34  ;;  %vm381_vm9 = vweird.f32 %v5233_v46  ;;  %vm593_vm2 = vcmp.eq.s32.totalorder %v4725_v22, 0  ;;  %v4777_v54 = vand.u32 3, %v4657_v19  ;;  %vm5211_vm5 = vweird.f32 %v5247_v42 }
 0x15c   :  { %v1007_v21 = vand.u32 3, %v1006_v14  ;;  %vm596_vm3 = vcmp.eq.s32.totalorder %v4725_v22, 2  ;;  %v1120_v63 = vsel %vm5211_vm5, nan, %v1119_v0  ;;  %v1010_v23 = vxor.u32 2147483648, %v4756_v25  ;;  %2815 = vperm.xlu0 %3197, %v137_v57  }
 0x15d   :  { %v1013_v35 = vxor.u32 2147483648, %v4750_v49  ;;  %v912_v19 = vsel %vm5210_vm1, nan, %v911_v2  ;;  %vm801_vm4 = vcmp.eq.s32.totalorder %v4759_v51, 0  ;;  %vm804_vm8 = vcmp.eq.s32.totalorder %v4759_v51, 2 }
 0x15e   :  { %v387_v56 = vsel %vm385_vm7, %v4723_v18, %v386_v50  ;;  %v390_v29 = vsel %vm388_vm10, %v389_v6, %v3217_v48  ;;  %v802_v41 = vxor.u32 2147483648, %v4772_v36  ;;  %v805_v47 = vxor.u32 2147483648, %v4761_v44 }
 0x15f   :  { %v1221_v61 = vsel %vm1219_vm0, %v389_v6, %v3217_v48  ;;  %vm1422_vm1 = vcmp.eq.s32.totalorder %v4777_v54, 0  ;;  %vm1425_vm5 = vcmp.eq.s32.totalorder %v4777_v54, 2  ;;  %v3030_v12 = vpack.c.bf16 %v1120_v63, %v912_v19  ;;  %v3227_v17 = vpop.eup %3226  ;;  %v50_v19 = vld [vmem:[%s5158_s2 + $0x50] sm:$0xff] }
 0x160   :  { %vm797_vm11 = vweird.f32 %v5245_v59  ;;  %vm1009_vm12 = vcmp.eq.s32.totalorder %v1007_v21, 0  ;;  %vm1012_vm13 = vcmp.eq.s32.totalorder %v1007_v21, 2  ;;  %v1218_v45 = vsel %vm1216_vm15, %v4723_v18, %v386_v50  ;;  %v3229_v60 = vpop.eup %3228  ;;  %v41_v59 = vld [vmem:[%s5158_s2 + $0x8] sm:$0xff] }
 0x161   :  { %v1011_v16 = vsel %vm1009_vm12, %v4750_v49, %v1010_v23  ;;  %v1014_v55 = vsel %vm1012_vm13, %v1013_v35, %v4756_v25  ;;  %v1729_v52 = vand.u32 3, %v4601_v26  ;;  %v391_v31 = vsel %vm384_vm14, %v387_v56, %v390_v29  ;;  %v43_v56 = vld [vmem:[%s5158_s2 + $0x18] sm:$0xff] }
 0x162   :  { %v597_v38 = vxor.u32 2147483648, %v3227_v17  ;;  %vm1005_vm7 = vweird.f32 %v5248_v40  ;;  %vm1008_vm10 = vcmp.lt.s32.totalorder %v1007_v21, 2  ;;  %v594_v53 = vxor.u32 2147483648, %v3229_v60  ;;  %v48_v40 = vld [vmem:[%s5158_s2 + $0x40] sm:$0xff]  ;;  %v51_v29 = vld [vmem:[%s5158_s2 + $0x58] sm:$0xff] }
 0x163   :  { %vm1421_vm15 = vcmp.lt.s32.totalorder %v4777_v54, 2  ;;  %v803_v18 = vsel %vm801_vm4, %v4761_v44, %v802_v41  ;;  %v806_v26 = vsel %vm804_vm8, %v805_v47, %v4772_v36  ;;  %v1935_v5 = vand.u32 3, %v4612_v32 }
 0x164   :  { %v598_v58 = vsel %vm596_vm3, %v597_v38, %v3229_v60  ;;  %v1222_v11 = vsel %vm1215_vm6, %v1218_v45, %v1221_v61  ;;  %v1015_v20 = vsel %vm1008_vm10, %v1011_v16, %v1014_v55  ;;  %v3034_v43 = vpack.c.bf16 %v1532_v28, %v4637_v4  ;;  %v45_v61 = vld [vmem:[%s5158_s2 + $0x28] sm:$0xff]  ;;  %v54_v45 = vld [vmem:[%s5158_s2 + $0x70] sm:$0xff]  ;;  %v47_v16 = vld [vmem:[%s5158_s2 + $0x38] sm:$0xff] }
 0x165   :  { %v392_v48 = vsel %vm381_vm9, nan, %v391_v31  ;;  %v595_v33 = vsel %vm593_vm2, %v3227_v17, %v594_v53  ;;  %vm1731_vm14 = vcmp.eq.s32.totalorder %v1729_v52, 0  ;;  %vm1734_vm0 = vcmp.eq.s32.totalorder %v1729_v52, 2  ;;  %v55_v55 = vld [vmem:[%s5158_s2 + $0x78] sm:$0xff] }
 0x166   :  { %vm5267_vm13 = vcmp.lt.s32.totalorder %v4725_v22, 2  ;;  %vm5268_vm12 = vcmp.lt.s32.totalorder %v4759_v51, 2  ;;  %v1733_v62 = vsel %vm1731_vm14, %v4645_v8, %v906_v10  ;;  %v1832_v4 = vand.u32 3, %v4715_v15 }
 0x167   :  { %v599_v32 = vsel %vm5267_vm13, %v595_v33, %v598_v58  ;;  %v807_v3 = vsel %vm5268_vm12, %v803_v18, %v806_v26  ;;  %vm5269_vm6 = vweird.f32 %v5238_v13  ;;  %v1016_v0 = vsel %vm1005_vm7, nan, %v1015_v20 }
 0x168   :  { %v600_v14 = vsel %vm5269_vm6, nan, %v599_v32  ;;  %vm1937_vm2 = vcmp.eq.s32.totalorder %v1935_v5, 0  ;;  %vm1940_vm3 = vcmp.eq.s32.totalorder %v1935_v5, 2  ;;  %v1626_v10 = vand.u32 3, %v4694_v24 }
 0x169   :  { %v3028_v28 = vpack.c.bf16 %v600_v14, %v392_v48  ;;  %v1939_v22 = vsel %vm1937_vm2, %v4653_v39, %v1114_v37  ;;  %v1942_v51 = vsel %vm1940_vm3, %v1117_v9, %v4665_v1  ;;  %v1424_v15 = vsel %vm1422_vm1, %v3227_v17, %v594_v53  ;;  %v46_v17 = vld [vmem:[%s5158_s2 + $0x30] sm:$0xff] }
 0x16a   :  { %v1427_v50 = vsel %vm1425_vm5, %v597_v38, %v3229_v60  ;;  %v808_v6 = vsel %vm797_vm11, nan, %v807_v3  ;;  %v1736_v37 = vsel %vm1734_vm0, %v909_v30, %v4674_v27  ;;  %vm1936_vm4 = vcmp.lt.s32.totalorder %v1935_v5, 2 }
 0x16b   :  { %3029 = vmatpush1.bf16.msra.mxu0 %v3028_v28  ;;  %3142 = vmatpush1.bf16.msra.mxu1 %v3028_v28  ;;  %v3032_v39 = vpack.c.bf16 %v1016_v0, %v808_v6  ;;  %vm1834_vm8 = vcmp.eq.s32.totalorder %v1832_v4, 0  ;;  %vm1837_vm10 = vcmp.eq.s32.totalorder %v1832_v4, 2  ;;  %v1223_v1 = vsel %vm381_vm9, nan, %v1222_v11 }
 0x16c   :  { %3031 = vmatprep.subr.bf16.mxu0 %v3030_v12  ;;  %3139 = vmatprep.subr.bf16.mxu1 %v3030_v12  ;;  %v1943_v9 = vsel %vm1936_vm4, %v1939_v22, %v1942_v51  ;;  %v1836_v24 = vsel %vm1834_vm8, %v4750_v49, %v1010_v23  ;;  %v1839_v8 = vsel %vm1837_vm10, %v1013_v35, %v4756_v25  ;;  %vm1730_vm1 = vcmp.lt.s32.totalorder %v1729_v52, 2  ;;  %v49_v23 = vld [vmem:[%s5158_s2 + $0x48] sm:$0xff]  ;;  %v42_v35 = vld [vmem:[%s5158_s2 + $0x10] sm:$0xff] }
 0x16d   :  { %v1428_v27 = vsel %vm1421_vm15, %v1424_v15, %v1427_v50  ;;  %vm1628_vm5 = vcmp.eq.s32.totalorder %v1626_v10, 0  ;;  %vm1631_vm14 = vcmp.eq.s32.totalorder %v1626_v10, 2  ;;  %v1737_v30 = vsel %vm1730_vm1, %v1733_v62, %v1736_v37  ;;  %vm5271_vm15 = vmmov %vm5269_vm6  ;;  %v53_v12 = vld [vmem:[%s5158_s2 + $0x68] sm:$0xff] }
 0x16e   :  { %v1630_v46 = vsel %vm1628_vm5, %v4761_v44, %v802_v41  ;;  %v1633_v2 = vsel %vm1631_vm14, %v805_v47, %v4772_v36  ;;  %vm1833_vm9 = vcmp.lt.s32.totalorder %v1832_v4, 2  ;;  %vm5270_vm0 = vweird.f32 %v5247_v42  ;;  %v44_v41 = vld [vmem:[%s5158_s2 + $0x20] sm:$0xff] }
 0x16f   :  { %3033 = vmatpush1.bf16.msra.mxu0 %v3032_v39  ;;  %3143 = vmatpush1.bf16.msra.mxu1 %v3032_v39  ;;  %v1944_v49 = vsel %vm5270_vm0, nan, %v1943_v9  ;;  %v1840_v25 = vsel %vm1833_vm9, %v1836_v24, %v1839_v8  ;;  %v1429_v57 = vsel %vm5271_vm15, nan, %v1428_v27  ;;  %vm1627_vm13 = vcmp.lt.s32.totalorder %v1626_v10, 2  ;;  %v52_v47 = vld [vmem:[%s5158_s2 + $0x60] sm:$0xff] }
 0x170   :  { %3035 = vmatprep.subr.bf16.mxu0 %v3034_v43  ;;  %3140 = vmatprep.subr.bf16.mxu1 %v3034_v43  ;;  %v3036_v54 = vpack.c.bf16 %v1429_v57, %v1223_v1  ;;  %vm5272_vm12 = vweird.f32 %v5246_v7  ;;  %v1634_v63 = vsel %vm1627_vm13, %v1630_v46, %v1633_v2  ;;  %v1841_v36 = vsel %vm1005_vm7, nan, %v1840_v25  ;;  %v40_v7 = vld [vmem:[%s5158_s2] sm:$0xff] }
 0x171   :  { %v1738_v21 = vsel %vm5272_vm12, nan, %v1737_v30  ;;  %v1635_v13 = vsel %vm797_vm11, nan, %v1634_v63  ;;  %vm2025_vm6 = vcmask 523264  }
 0x172   :  { %v3038_v44 = vpack.c.bf16 %v1944_v49, %v1738_v21  ;;  %v3040_v42 = vpack.c.bf16 %v1841_v36, %v1635_v13 }
 0x173   :  { %3037 = vmatpush1.bf16.msra.mxu0 %v3036_v54  ;;  %3144 = vmatpush1.bf16.msra.mxu1 %v3036_v54  ;;  %v1948_v52 = vpop.permute.xlu1 %1947 }
 0x174   :  { %3039 = vmatprep.subr.bf16.mxu0 %v3038_v44  ;;  %3141 = vmatprep.subr.bf16.mxu1 %v3038_v44 }
 0x177   :  { %3041 = vmatpush1.bf16.msra.mxu0 %v3040_v42  ;;  %3145 = vmatpush1.bf16.msra.mxu1 %v3040_v42  ;;  %v1958_v60 = vpop.permute.xlu1 %1957 }
 0x17a   :  { %3010 = vmatmul.mubr.msk.f32.vlgmr.msra.gmra.mrb[0].mxu0 %vm2025_vm6, %v40_v7  ;;  %3018 = vmatmul.mubr.msk.f32.vlgmr.msra.gmra.mrb[0].mxu1 %vm2025_vm6, %v48_v40 }
 0x17b   :  { %2144 = vmatprep.mubr.f32.mxu0 %v3463_v34  ;;  %2192 = vmatprep.mubr.f32.mxu1 %v3463_v34  ;;  %v1963_v38 = vpop.permute.xlu1 %1962 }
 0x17c   :  { %v1953_v31 = vpop.permute.xlu0 %1952 }
 0x17e   :  { %3011 = vmatmul.mubr.msk.f32.gmra.mrb[2].mxu0 %vm2025_vm6, %v41_v59  ;;  %3019 = vmatmul.mubr.msk.f32.gmra.mrb[2].mxu1 %vm2025_vm6, %v49_v23 }
 0x17f   :  { %2150 = vmatprep.mubr.f32.mxu0 %v3463_v34  ;;  %2198 = vmatprep.mubr.f32.mxu1 %v3463_v34  ;;  %v4975_v18 = vpop.permute.xlu1 %1972 }
 0x180   :  { %v4973_v53 = vpop.permute.xlu0 %1967 }
 0x182   :  { %3012 = vmatmul.mubr.msk.f32.gmra.mrb[4].mxu0 %vm2025_vm6, %v42_v35  ;;  %3020 = vmatmul.mubr.msk.f32.gmra.mrb[4].mxu1 %vm2025_vm6, %v50_v19 }
 0x183   :  { %2156 = vmatprep.mubr.f32.mxu0 %v3463_v34  ;;  %2204 = vmatprep.mubr.f32.mxu1 %v3463_v34  ;;  %v4979_v5 = vpop.permute.xlu1 %1982 }
 0x184   :  { %v4977_v26 = vpop.permute.xlu0 %1977 }
 0x186   :  { %3013 = vmatmul.mubr.msk.f32.gmra.mrb[6].mxu0 %vm2025_vm6, %v43_v56  ;;  %3021 = vmatmul.mubr.msk.f32.gmra.mrb[6].mxu1 %vm2025_vm6, %v51_v29 }
 0x187   :  { %2162 = vmatprep.mubr.f32.mxu0 %v3463_v34  ;;  %2210 = vmatprep.mubr.f32.mxu1 %v3463_v34  ;;  %v1993_v4 = vpop.permute.xlu1 %1992 }
 0x188   :  { %v1988_v58 = vpop.permute.xlu0 %1987 }
 0x18a   :  { %3014 = vmatmul.mubr.msk.f32.gmra.mrb[8].mxu0 %vm2025_vm6, %v44_v41  ;;  %3022 = vmatmul.mubr.msk.f32.gmra.mrb[8].mxu1 %vm2025_vm6, %v52_v47 }
 0x18b   :  { %2168 = vmatprep.mubr.f32.mxu0 %v3463_v34  ;;  %2216 = vmatprep.mubr.f32.mxu1 %v3463_v34  ;;  %v2003_v46 = vpop.permute.xlu1 %2002 }
 0x18c   :  { %v1998_v6 = vpop.permute.xlu0 %1997 }
 0x18e   :  { %3015 = vmatmul.mubr.msk.f32.gmra.mrb[10].mxu0 %vm2025_vm6, %v45_v61  ;;  %3023 = vmatmul.mubr.msk.f32.gmra.mrb[10].mxu1 %vm2025_vm6, %v53_v12 }
 0x18f   :  { %2174 = vmatprep.mubr.f32.mxu0 %v3463_v34  ;;  %2222 = vmatprep.mubr.f32.mxu1 %v3463_v34 }
 0x190   :  { %v2008_v7 = vpop.permute.xlu0 %2007 }
 0x192   :  { %3016 = vmatmul.mubr.msk.f32.gmra.mrb[12].mxu0 %vm2025_vm6, %v46_v17  ;;  %3024 = vmatmul.mubr.msk.f32.gmra.mrb[12].mxu1 %vm2025_vm6, %v54_v45 }
 0x193   :  { %2180 = vmatprep.mubr.f32.mxu0 %v3463_v34  ;;  %2228 = vmatprep.mubr.f32.mxu1 %v3463_v34 }
 0x196   :  { %3017 = vmatmul.mubr.msk.f32.gmra.mrb[14].mxu0 %vm2025_vm6, %v47_v16  ;;  %3025 = vmatmul.mubr.msk.f32.gmra.mrb[14].mxu1 %vm2025_vm6, %v55_v55  ;;  %v2013_v16 = vpop.permute.xlu1 %2012 }
 0x197   :  { %2411 = vmatprep.mubr.f32.mxu1 %v3463_v34  ;;  %2684 = vmatprep.mubr.f32.mxu0 %v3463_v34 }
 0x24d   :  { %v2140_v11 = vpop.f32.mrb[0].mxu0  ;;  %v2188_v20 = vpop.f32.mrb[0].mxu1 }
 0x24e   :  { %v2141_v43 = vadd.f32 %v2140_v11, %v1948_v52  ;;  %v2142_v48 = vpop.f32.mrb[1].mxu0  ;;  %v2189_v33 = vadd.f32 %v2188_v20, %v1988_v58  ;;  %v2190_v32 = vpop.f32.mrb[1].mxu1 }
 0x24f   :  { %v2143_v3 = vadd.f32 %v2142_v48, %v1948_v52  ;;  %v2191_v62 = vadd.f32 %v2190_v32, %v1988_v58 }
 0x250   :  { %3230 = vtanh.f32 %v2141_v43 }
 0x251   :  { %3232 = vtanh.f32 %v2143_v3  ;;  %v2146_v14 = vpop.f32.mrb[2].mxu0  ;;  %v2194_v0 = vpop.f32.mrb[2].mxu1 }
 0x252   :  { %v2147_v28 = vadd.f32 %v2146_v14, %v1953_v31  ;;  %v2148_v22 = vpop.f32.mrb[3].mxu0  ;;  %3234 = vtanh.f32 %v2189_v33  ;;  %v2195_v51 = vadd.f32 %v2194_v0, %v1993_v4  ;;  %v2196_v10 = vpop.f32.mrb[3].mxu1 }
 0x253   :  { %v2149_v15 = vadd.f32 %v2148_v22, %v1953_v31  ;;  %3236 = vtanh.f32 %v2191_v62  ;;  %v2197_v50 = vadd.f32 %v2196_v10, %v1993_v4  ;;  %v2018_v4 = vpop.permute.xlu0 %2017 }
 0x254   :  { %3238 = vtanh.f32 %v2147_v28 }
 0x255   :  { %3240 = vtanh.f32 %v2149_v15  ;;  %v2152_v37 = vpop.f32.mrb[4].mxu0  ;;  %v2200_v39 = vpop.f32.mrb[4].mxu1 }
 0x256   :  { %v2153_v1 = vadd.f32 %v2152_v37, %v1958_v60  ;;  %3242 = vtanh.f32 %v2195_v51  ;;  %v2154_v9 = vpop.f32.mrb[5].mxu0  ;;  %v2201_v24 = vadd.f32 %v2200_v39, %v1998_v6  ;;  %v2202_v8 = vpop.f32.mrb[5].mxu1 }
 0x257   :  { %v2155_v27 = vadd.f32 %v2154_v9, %v1958_v60  ;;  %3244 = vtanh.f32 %v2197_v50  ;;  %v2203_v30 = vadd.f32 %v2202_v8, %v1998_v6  ;;  %v2023_v9 = vpop.permute.xlu1 %2022 }
 0x258   :  { %3246 = vtanh.f32 %v2153_v1 }
 0x259   :  { %3248 = vtanh.f32 %v2155_v27  ;;  %v2158_v2 = vpop.f32.mrb[6].mxu0  ;;  %v2206_v49 = vpop.f32.mrb[6].mxu1 }
 0x25a   :  { %v3231_v25 = vpop.eup %3230  ;;  %3250 = vtanh.f32 %v2201_v24  ;;  %v2159_v57 = vadd.f32 %v2158_v2, %v1963_v38  ;;  %v2207_v54 = vadd.f32 %v2206_v49, %v2003_v46  ;;  %v2160_v21 = vpop.f32.mrb[7].mxu0 }
 0x25b   :  { %v2208_v63 = vpop.f32.mrb[7].mxu1  ;;  %v3233_v44 = vpop.eup %3232  ;;  %3252 = vtanh.f32 %v2203_v30  ;;  %v2161_v36 = vadd.f32 %v2160_v21, %v1963_v38 }
 0x25c   :  { %v2209_v13 = vadd.f32 %v2208_v63, %v2003_v46  ;;  %v4981_v42 = vpop.eup %3234  ;;  %3254 = vtanh.f32 %v2159_v57 }
 0x25d   :  { %v4983_v40 = vpop.eup %3236  ;;  %3256 = vtanh.f32 %v2207_v54  ;;  %v2164_v59 = vpop.f32.mrb[8].mxu0 }
 0x25e   :  { %v2212_v23 = vpop.f32.mrb[8].mxu1  ;;  %v3239_v35 = vpop.eup %3238  ;;  %3258 = vtanh.f32 %v2161_v36  ;;  %v2165_v19 = vadd.f32 %v2164_v59, %v4973_v53 }
 0x25f   :  { %v2213_v56 = vadd.f32 %v2212_v23, %v2008_v7  ;;  %v2166_v29 = vpop.f32.mrb[9].mxu0  ;;  %v2214_v41 = vpop.f32.mrb[9].mxu1  ;;  %3260 = vtanh.f32 %v2209_v13  ;;  %v3044_v17 = vpack.c.bf16 %v3239_v35, %v3231_v25 }
 0x260   :  { %v3241_v47 = vpop.eup %3240  ;;  %v2167_v61 = vadd.f32 %v2166_v29, %v4973_v53  ;;  %v2215_v12 = vadd.f32 %v2214_v41, %v2008_v7  ;;  %3262 = vtanh.f32 %v2165_v19 }
 0x261   :  { %v4987_v45 = vpop.eup %3242  ;;  %v3042_v55 = vpack.c.bf16 %v3241_v47, %v3233_v44  ;;  %3264 = vtanh.f32 %v2213_v56  ;;  %v2170_v60 = vpop.f32.mrb[10].mxu0 }
 0x262   :  { %v4989_v52 = vpop.eup %3244  ;;  %v2218_v31 = vpop.f32.mrb[10].mxu1  ;;  %v3060_v38 = vpack.c.bf16 %v4987_v45, %v4981_v42  ;;  %3266 = vtanh.f32 %v2167_v61  ;;  %v2171_v11 = vadd.f32 %v2170_v60, %v4975_v18  ;;  %v74_v42 = vld [vmem:[%s5160_s4 + $0x10] sm:$0xff]  ;;  %v75_v45 = vld [vmem:[%s5160_s4 + $0x18] sm:$0xff] }
 0x263   :  { %v3247_v58 = vpop.eup %3246  ;;  %v2219_v53 = vadd.f32 %v2218_v31, %v2013_v16  ;;  %v2172_v20 = vpop.f32.mrb[11].mxu0  ;;  %3043 = vmatprep.subr.bf16.mxu1 %v3042_v55  ;;  %v3058_v48 = vpack.c.bf16 %v4989_v52, %v4983_v40  ;;  %3268 = vtanh.f32 %v2215_v12  ;;  %v73_v40 = vld [vmem:[%s5160_s4 + $0x8] sm:$0xff]  ;;  %v76_v52 = vld [vmem:[%s5160_s4 + $0x20] sm:$0xff] }
 0x264   :  { %v2220_v43 = vpop.f32.mrb[11].mxu1  ;;  %v3249_v33 = vpop.eup %3248  ;;  %v2173_v32 = vadd.f32 %v2172_v20, %v4975_v18  ;;  %3045 = vmatpush1.bf16.msra.mxu1 %v3044_v17  ;;  %3270 = vtanh.f32 %v2171_v11  ;;  %v72_v20 = vld [vmem:[%s5160_s4] sm:$0xff] }
 0x265   :  { %v2221_v3 = vadd.f32 %v2220_v43, %v2013_v16  ;;  %v4997_v62 = vpop.eup %3250  ;;  %3272 = vtanh.f32 %v2219_v53  ;;  %v2176_v0 = vpop.f32.mrb[12].mxu0  ;;  %v78_v43 = vld [vmem:[%s5160_s4 + $0x30] sm:$0xff] }
 0x266   :  { %v4999_v14 = vpop.eup %3252  ;;  %v2224_v28 = vpop.f32.mrb[12].mxu1  ;;  %3274 = vtanh.f32 %v2173_v32  ;;  %v2177_v51 = vadd.f32 %v2176_v0, %v4977_v26  ;;  %v81_v32 = vld [vmem:[%s5160_s4 + $0x48] sm:$0xff]  ;;  %v86_v0 = vld [vmem:[%s5160_s4 + $0x70] sm:$0xff] }
 0x267   :  { %v3255_v22 = vpop.eup %3254  ;;  %v2225_v10 = vadd.f32 %v2224_v28, %v2018_v4  ;;  %v2178_v15 = vpop.f32.mrb[13].mxu0  ;;  %3276 = vtanh.f32 %v2221_v3  ;;  %v82_v3 = vld [vmem:[%s5160_s4 + $0x50] sm:$0xff]  ;;  %v87_v28 = vld [vmem:[%s5160_s4 + $0x78] sm:$0xff] }
 0x268   :  { %v2226_v50 = vpop.f32.mrb[13].mxu1  ;;  %v3257_v6 = vpop.eup %3256  ;;  %v2179_v18 = vadd.f32 %v2178_v15, %v4977_v26  ;;  %v3048_v39 = vpack.c.bf16 %v3255_v22, %v3247_v58  ;;  %3278 = vtanh.f32 %v2177_v51 }
 0x269   :  { %v2227_v37 = vadd.f32 %v2226_v50, %v2018_v4  ;;  %v3259_v1 = vpop.eup %3258  ;;  %v3064_v24 = vpack.c.bf16 %v3257_v6, %v4997_v62  ;;  %3280 = vtanh.f32 %v2225_v10  ;;  %v2182_v27 = vpop.f32.mrb[14].mxu0  ;;  %v83_v62 = vld [vmem:[%s5160_s4 + $0x58] sm:$0xff]  ;;  %v84_v4 = vld [vmem:[%s5160_s4 + $0x60] sm:$0xff] }
 0x26a   :  { %v3261_v8 = vpop.eup %3260  ;;  %v2230_v30 = vpop.f32.mrb[14].mxu1  ;;  %v3046_v46 = vpack.c.bf16 %v3259_v1, %v3249_v33  ;;  %3282 = vtanh.f32 %v2179_v18  ;;  %v2183_v49 = vadd.f32 %v2182_v27, %v4979_v5  ;;  %v80_v33 = vld [vmem:[%s5160_s4 + $0x40] sm:$0xff] }
 0x26b   :  { %v3263_v2 = vpop.eup %3262  ;;  %v2231_v25 = vadd.f32 %v2230_v30, %v2023_v9  ;;  %v2184_v57 = vpop.f32.mrb[15].mxu0  ;;  %v3062_v26 = vpack.c.bf16 %v3261_v8, %v4999_v14  ;;  %3284 = vtanh.f32 %v2227_v37  ;;  %v85_v14 = vld [vmem:[%s5160_s4 + $0x68] sm:$0xff] }
 0x26c   :  { %v2232_v54 = vpop.f32.mrb[15].mxu1  ;;  %v3265_v21 = vpop.eup %3264  ;;  %v2185_v63 = vadd.f32 %v2184_v57, %v4979_v5  ;;  %3047 = vmatprep.subr.bf16.mxu1 %v3046_v46  ;;  %3286 = vtanh.f32 %v2183_v49 }
 0x26d   :  { %v2233_v44 = vadd.f32 %v2232_v54, %v2023_v9  ;;  %v3267_v36 = vpop.eup %3266  ;;  %3049 = vmatpush1.bf16.msra.mxu1 %v3048_v39  ;;  %3288 = vtanh.f32 %v2231_v25  ;;  %v2270_v22 = vpop.permute.xlu0 %2269 }
 0x26e   :  { %v3269_v13 = vpop.eup %3268  ;;  %3290 = vtanh.f32 %v2185_v63  ;;  %v2275_v6 = vpop.permute.xlu1 %2274 }
 0x26f   :  { %v3271_v7 = vpop.eup %3270  ;;  %3292 = vtanh.f32 %v2233_v44 }
 0x270   :  { %v3273_v59 = vpop.eup %3272  ;;  %v3052_v23 = vpack.c.bf16 %v3271_v7, %v3263_v2 }
 0x271   :  { %v3275_v35 = vpop.eup %3274  ;;  %v3068_v19 = vpack.c.bf16 %v3273_v59, %v3265_v21  ;;  %v2280_v9 = vpop.permute.xlu0 %2279 }
 0x272   :  { %v3277_v56 = vpop.eup %3276  ;;  %v3050_v29 = vpack.c.bf16 %v3275_v35, %v3267_v36  ;;  %v2285_v46 = vpop.permute.xlu1 %2284 }
 0x273   :  { %v3279_v41 = vpop.eup %3278  ;;  %v3066_v47 = vpack.c.bf16 %v3277_v56, %v3269_v13 }
 0x274   :  { %v3281_v61 = vpop.eup %3280  ;;  %3051 = vmatprep.subr.bf16.mxu1 %v3050_v29 }
 0x275   :  { %v3283_v5 = vpop.eup %3282  ;;  %3053 = vmatpush1.bf16.msra.mxu1 %v3052_v23  ;;  %v2290_v21 = vpop.permute.xlu0 %2289 }
 0x276   :  { %v3285_v12 = vpop.eup %3284 }
 0x277   :  { %v3287_v17 = vpop.eup %3286 }
 0x278   :  { %v3289_v16 = vpop.eup %3288  ;;  %v3056_v55 = vpack.c.bf16 %v3287_v17, %v3279_v41 }
 0x279   :  { %v3291_v60 = vpop.eup %3290  ;;  %v3072_v31 = vpack.c.bf16 %v3289_v16, %v3281_v61 }
 0x27a   :  { %v3293_v58 = vpop.eup %3292  ;;  %v3054_v11 = vpack.c.bf16 %v3291_v60, %v3283_v5 }
 0x27b   :  { %v3070_v53 = vpack.c.bf16 %v3293_v58, %v3285_v12  ;;  %v2300_v12 = vpop.permute.xlu0 %2299 }
 0x27c   :  { %3055 = vmatprep.subr.bf16.mxu1 %v3054_v11 }
 0x27d   :  { %3057 = vmatpush1.bf16.msra.mxu1 %v3056_v55 }
 0x27e   :  { %3059 = vmatprep.subr.bf16.mxu1 %v3058_v48  ;;  %v79_v48 = vld [vmem:[%s5160_s4 + $0x38] sm:$0xff] }
 0x281   :  { %3061 = vmatpush1.bf16.msra.mxu1 %v3060_v38  ;;  %v77_v38 = vld [vmem:[%s5160_s4 + $0x28] sm:$0xff] }
 0x282   :  { %3063 = vmatprep.subr.bf16.mxu1 %v3062_v26 }
 0x285   :  { %3065 = vmatpush1.bf16.msra.mxu1 %v3064_v24 }
 0x286   :  { %3067 = vmatprep.subr.bf16.mxu1 %v3066_v47 }
 0x289   :  { %3069 = vmatpush1.bf16.msra.mxu1 %v3068_v19  ;;  %v2295_v19 = vpop.permute.xlu1 %2294 }
 0x28a   :  { %3071 = vmatprep.subr.bf16.mxu1 %v3070_v53 }
 0x28d   :  { %3073 = vmatpush1.bf16.msra.mxu1 %v3072_v31 }
 0x290   :  { %2412 = vmatmul.mubr.f32.vlgmr.msra.gmra.mrb[16].mxu1 %v72_v20  ;;  %v2305_v20 = vpop.permute.xlu1 %2304 }
 0x291   :  { %2417 = vmatprep.mubr.f32.mxu1 %v3463_v34 }
 0x294   :  { %2418 = vmatmul.mubr.f32.gmra.mrb[18].mxu1 %v73_v40 }
 0x295   :  { %2423 = vmatprep.mubr.f32.mxu1 %v3463_v34 }
 0x298   :  { %2424 = vmatmul.mubr.f32.gmra.mrb[20].mxu1 %v74_v42 }
 0x299   :  { %2429 = vmatprep.mubr.f32.mxu1 %v3463_v34 }
 0x29c   :  { %2430 = vmatmul.mubr.f32.gmra.mrb[22].mxu1 %v75_v45 }
 0x29d   :  { %2435 = vmatprep.mubr.f32.mxu1 %v3463_v34 }
 0x2a0   :  { %2436 = vmatmul.mubr.f32.gmra.mrb[24].mxu1 %v76_v52 }
 0x2a1   :  { %2441 = vmatprep.mubr.f32.mxu1 %v3463_v34 }
 0x2a4   :  { %2442 = vmatmul.mubr.f32.gmra.mrb[26].mxu1 %v77_v38 }
 0x2a5   :  { %2447 = vmatprep.mubr.f32.mxu1 %v3463_v34 }
 0x2a8   :  { %2448 = vmatmul.mubr.f32.gmra.mrb[28].mxu1 %v78_v43 }
 0x2a9   :  { %2453 = vmatprep.mubr.f32.mxu1 %v3463_v34 }
 0x2ac   :  { %2454 = vmatmul.mubr.f32.gmra.mrb[30].mxu1 %v79_v48  ;;  %v2310_v48 = vpop.permute.xlu0 %2309 }
 0x2ad   :  { %2459 = vmatprep.mubr.f32.mxu1 %v3463_v34 }
 0x2b0   :  { %2460 = vmatmul.mubr.f32.gmra.mrb[32].mxu1 %v80_v33 }
 0x2b1   :  { %2465 = vmatprep.mubr.f32.mxu1 %v3463_v34 }
 0x2b4   :  { %2466 = vmatmul.mubr.f32.gmra.mrb[34].mxu1 %v81_v32 }
 0x2b5   :  { %2471 = vmatprep.mubr.f32.mxu1 %v3463_v34 }
 0x2b8   :  { %2472 = vmatmul.mubr.f32.gmra.mrb[36].mxu1 %v82_v3 }
 0x2b9   :  { %2477 = vmatprep.mubr.f32.mxu1 %v3463_v34 }
 0x2bc   :  { %2478 = vmatmul.mubr.f32.gmra.mrb[38].mxu1 %v83_v62 }
 0x2bd   :  { %2483 = vmatprep.mubr.f32.mxu1 %v3463_v34 }
 0x2c0   :  { %2484 = vmatmul.mubr.f32.gmra.mrb[40].mxu1 %v84_v4 }
 0x2c1   :  { %2489 = vmatprep.mubr.f32.mxu1 %v3463_v34 }
 0x2c4   :  { %2490 = vmatmul.mubr.f32.gmra.mrb[42].mxu1 %v85_v14 }
 0x2c5   :  { %2495 = vmatprep.mubr.f32.mxu1 %v3463_v34 }
 0x2c8   :  { %2496 = vmatmul.mubr.f32.gmra.mrb[44].mxu1 %v86_v0 }
 0x2c9   :  { %2501 = vmatprep.mubr.f32.mxu1 %v3463_v34 }
 0x2cc   :  { %2502 = vmatmul.mubr.f32.gmra.mrb[46].mxu1 %v87_v28 }
 0x2cd   :  { %2882 = vmatprep.mubr.f32.mxu1 %v3463_v34 }
 0x363   :  { %v2413_v51 = vpop.f32.mrb[16].mxu1 }
 0x364   :  { %v2414_v10 = vadd.f32 %v2413_v51, %v2270_v22  ;;  %v2415_v15 = vpop.f32.mrb[17].mxu1 }
 0x365   :  { %v2416_v50 = vadd.f32 %v2415_v15, %v2270_v22  ;;  %v2315_v22 = vpop.permute.xlu1 %2314 }
 0x366   :  { %3294 = vtanh.f32 %v2414_v10 }
 0x367   :  { %v2419_v18 = vpop.f32.mrb[18].mxu1  ;;  %3296 = vtanh.f32 %v2416_v50 }
 0x368   :  { %v2420_v37 = vadd.f32 %v2419_v18, %v2275_v6  ;;  %v2421_v39 = vpop.f32.mrb[19].mxu1 }
 0x369   :  { %v2422_v1 = vadd.f32 %v2421_v39, %v2275_v6 }
 0x36a   :  { %3298 = vtanh.f32 %v2420_v37  ;;  %v2320_v37 = vpop.permute.xlu0 %2319 }
 0x36b   :  { %3300 = vtanh.f32 %v2422_v1  ;;  %v2425_v24 = vpop.f32.mrb[20].mxu1 }
 0x36c   :  { %v2426_v8 = vadd.f32 %v2425_v24, %v2280_v9  ;;  %v2427_v27 = vpop.f32.mrb[21].mxu1 }
 0x36d   :  { %v2428_v30 = vadd.f32 %v2427_v27, %v2280_v9 }
 0x36e   :  { %3302 = vtanh.f32 %v2426_v8 }
 0x36f   :  { %v2431_v2 = vpop.f32.mrb[22].mxu1  ;;  %3304 = vtanh.f32 %v2428_v30 }
 0x370   :  { %v2432_v49 = vadd.f32 %v2431_v2, %v2285_v46  ;;  %v2433_v25 = vpop.f32.mrb[23].mxu1  ;;  %v3295_v54 = vpop.eup %3294 }
 0x371   :  { %v2434_v57 = vadd.f32 %v2433_v25, %v2285_v46  ;;  %v3297_v26 = vpop.eup %3296  ;;  %v2325_v2 = vpop.permute.xlu1 %2324 }
 0x372   :  { %3306 = vtanh.f32 %v2432_v49 }
 0x373   :  { %3308 = vtanh.f32 %v2434_v57  ;;  %v2437_v63 = vpop.f32.mrb[24].mxu1 }
 0x374   :  { %v3299_v44 = vpop.eup %3298  ;;  %v2438_v36 = vadd.f32 %v2437_v63, %v2290_v21  ;;  %v2439_v13 = vpop.f32.mrb[25].mxu1 }
 0x375   :  { %v3301_v7 = vpop.eup %3300  ;;  %v2440_v59 = vadd.f32 %v2439_v13, %v2290_v21  ;;  %v3076_v23 = vpack.c.bf16 %v3299_v44, %v3295_v54  ;;  %v2330_v63 = vpop.permute.xlu0 %2329 }
 0x376   :  { %v3074_v35 = vpack.c.bf16 %v3301_v7, %v3297_v26  ;;  %3310 = vtanh.f32 %v2438_v36 }
 0x377   :  { %v2443_v56 = vpop.f32.mrb[26].mxu1  ;;  %3312 = vtanh.f32 %v2440_v59 }
 0x378   :  { %v2444_v29 = vadd.f32 %v2443_v56, %v2295_v19  ;;  %v2445_v41 = vpop.f32.mrb[27].mxu1  ;;  %3075 = vmatprep.subr.bf16.mxu0 %v3074_v35  ;;  %v3303_v61 = vpop.eup %3302 }
 0x379   :  { %v2446_v47 = vadd.f32 %v2445_v41, %v2295_v19  ;;  %3077 = vmatpush1.bf16.msra.mxu0 %v3076_v23  ;;  %v3305_v5 = vpop.eup %3304  ;;  %v2335_v56 = vpop.permute.xlu1 %2334 }
 0x37a   :  { %3314 = vtanh.f32 %v2444_v29 }
 0x37b   :  { %3316 = vtanh.f32 %v2446_v47  ;;  %v2449_v17 = vpop.f32.mrb[28].mxu1 }
 0x37c   :  { %v3307_v16 = vpop.eup %3306  ;;  %v2450_v55 = vadd.f32 %v2449_v17, %v2300_v12  ;;  %v2451_v60 = vpop.f32.mrb[29].mxu1 }
 0x37d   :  { %v3309_v31 = vpop.eup %3308  ;;  %v2452_v58 = vadd.f32 %v2451_v60, %v2300_v12  ;;  %v3080_v11 = vpack.c.bf16 %v3307_v16, %v3303_v61  ;;  %v2340_v17 = vpop.permute.xlu0 %2339 }
 0x37e   :  { %v3078_v53 = vpack.c.bf16 %v3309_v31, %v3305_v5  ;;  %3318 = vtanh.f32 %v2450_v55 }
 0x37f   :  { %v2455_v40 = vpop.f32.mrb[30].mxu1  ;;  %3320 = vtanh.f32 %v2452_v58 }
 0x380   :  { %v2456_v42 = vadd.f32 %v2455_v40, %v2305_v20  ;;  %v2457_v45 = vpop.f32.mrb[31].mxu1  ;;  %3079 = vmatprep.subr.bf16.mxu0 %v3078_v53  ;;  %v3311_v38 = vpop.eup %3310 }
 0x381   :  { %v2458_v52 = vadd.f32 %v2457_v45, %v2305_v20  ;;  %3081 = vmatpush1.bf16.msra.mxu0 %v3080_v11  ;;  %v3313_v43 = vpop.eup %3312  ;;  %v2345_v40 = vpop.permute.xlu1 %2344 }
 0x382   :  { %3322 = vtanh.f32 %v2456_v42 }
 0x383   :  { %3324 = vtanh.f32 %v2458_v52  ;;  %v2461_v33 = vpop.f32.mrb[32].mxu1 }
 0x384   :  { %v3315_v32 = vpop.eup %3314  ;;  %v2462_v3 = vadd.f32 %v2461_v33, %v2310_v48  ;;  %v2463_v62 = vpop.f32.mrb[33].mxu1 }
 0x385   :  { %v3317_v4 = vpop.eup %3316  ;;  %v2464_v14 = vadd.f32 %v2463_v62, %v2310_v48  ;;  %v3084_v0 = vpack.c.bf16 %v3315_v32, %v3311_v38 }
 0x386   :  { %v3082_v28 = vpack.c.bf16 %v3317_v4, %v3313_v43  ;;  %3326 = vtanh.f32 %v2462_v3 }
 0x387   :  { %v2467_v51 = vpop.f32.mrb[34].mxu1  ;;  %3328 = vtanh.f32 %v2464_v14 }
 0x388   :  { %v2468_v10 = vadd.f32 %v2467_v51, %v2315_v22  ;;  %v2469_v15 = vpop.f32.mrb[35].mxu1  ;;  %3083 = vmatprep.subr.bf16.mxu0 %v3082_v28  ;;  %v3319_v6 = vpop.eup %3318 }
 0x389   :  { %v2470_v50 = vadd.f32 %v2469_v15, %v2315_v22  ;;  %3085 = vmatpush1.bf16.msra.mxu0 %v3084_v0  ;;  %v3321_v18 = vpop.eup %3320  ;;  %v105_v15 = vld [vmem:[%s5162_s6 + $0x8] sm:$0xff] }
 0x38a   :  { %3330 = vtanh.f32 %v2468_v10  ;;  %v104_v10 = vld [vmem:[%s5162_s6] sm:$0xff] }
 0x38b   :  { %3332 = vtanh.f32 %v2470_v50  ;;  %v2473_v39 = vpop.f32.mrb[36].mxu1  ;;  %v106_v50 = vld [vmem:[%s5162_s6 + $0x10] sm:$0xff] }
 0x38c   :  { %v3323_v1 = vpop.eup %3322  ;;  %v2474_v9 = vadd.f32 %v2473_v39, %v2320_v37  ;;  %v2475_v24 = vpop.f32.mrb[37].mxu1  ;;  %v110_v39 = vld [vmem:[%s5162_s6 + $0x30] sm:$0xff] }
 0x38d   :  { %v3325_v8 = vpop.eup %3324  ;;  %v2476_v27 = vadd.f32 %v2475_v24, %v2320_v37  ;;  %v3088_v30 = vpack.c.bf16 %v3323_v1, %v3319_v6  ;;  %v107_v6 = vld [vmem:[%s5162_s6 + $0x18] sm:$0xff]  ;;  %v109_v37 = vld [vmem:[%s5162_s6 + $0x28] sm:$0xff] }
 0x38e   :  { %v3086_v46 = vpack.c.bf16 %v3325_v8, %v3321_v18  ;;  %3334 = vtanh.f32 %v2474_v9  ;;  %v108_v18 = vld [vmem:[%s5162_s6 + $0x20] sm:$0xff]  ;;  %v111_v1 = vld [vmem:[%s5162_s6 + $0x38] sm:$0xff]  ;;  %v113_v24 = vld [vmem:[%s5162_s6 + $0x48] sm:$0xff] }
 0x38f   :  { %v2479_v49 = vpop.f32.mrb[38].mxu1  ;;  %3336 = vtanh.f32 %v2476_v27  ;;  %v112_v9 = vld [vmem:[%s5162_s6 + $0x40] sm:$0xff]  ;;  %v114_v8 = vld [vmem:[%s5162_s6 + $0x50] sm:$0xff]  ;;  %v115_v27 = vld [vmem:[%s5162_s6 + $0x58] sm:$0xff] }
 0x390   :  { %v2480_v25 = vadd.f32 %v2479_v49, %v2325_v2  ;;  %v2481_v57 = vpop.f32.mrb[39].mxu1  ;;  %3087 = vmatprep.subr.bf16.mxu0 %v3086_v46  ;;  %v3327_v26 = vpop.eup %3326  ;;  %v117_v46 = vld [vmem:[%s5162_s6 + $0x68] sm:$0xff]  ;;  %v119_v49 = vld [vmem:[%s5162_s6 + $0x78] sm:$0xff] }
 0x391   :  { %v2482_v54 = vadd.f32 %v2481_v57, %v2325_v2  ;;  %3089 = vmatpush1.bf16.msra.mxu0 %v3088_v30  ;;  %v3329_v21 = vpop.eup %3328  ;;  %v116_v30 = vld [vmem:[%s5162_s6 + $0x60] sm:$0xff]  ;;  %v118_v2 = vld [vmem:[%s5162_s6 + $0x70] sm:$0xff] }
 0x392   :  { %3338 = vtanh.f32 %v2480_v25  ;;  %v2543_v25 = vpop.permute.xlu0 %2542 }
 0x393   :  { %3340 = vtanh.f32 %v2482_v54  ;;  %v2485_v44 = vpop.f32.mrb[40].mxu1 }
 0x394   :  { %v3331_v36 = vpop.eup %3330  ;;  %v2486_v13 = vadd.f32 %v2485_v44, %v2330_v63  ;;  %v2487_v7 = vpop.f32.mrb[41].mxu1 }
 0x395   :  { %v3333_v59 = vpop.eup %3332  ;;  %v2488_v23 = vadd.f32 %v2487_v7, %v2330_v63  ;;  %v3092_v35 = vpack.c.bf16 %v3331_v36, %v3327_v26  ;;  %v2548_v63 = vpop.permute.xlu1 %2547 }
 0x396   :  { %v3090_v19 = vpack.c.bf16 %v3333_v59, %v3329_v21  ;;  %3342 = vtanh.f32 %v2486_v13  ;;  %v2553_v59 = vpop.permute.xlu0 %2552 }
 0x397   :  { %v2491_v29 = vpop.f32.mrb[42].mxu1  ;;  %3344 = vtanh.f32 %v2488_v23 }
 0x398   :  { %v2492_v41 = vadd.f32 %v2491_v29, %v2335_v56  ;;  %v2493_v47 = vpop.f32.mrb[43].mxu1  ;;  %3091 = vmatprep.subr.bf16.mxu0 %v3090_v19  ;;  %v3335_v5 = vpop.eup %3334 }
 0x399   :  { %v2494_v61 = vadd.f32 %v2493_v47, %v2335_v56  ;;  %3093 = vmatpush1.bf16.msra.mxu0 %v3092_v35  ;;  %v3337_v12 = vpop.eup %3336  ;;  %v2558_v56 = vpop.permute.xlu1 %2557 }
 0x39a   :  { %3346 = vtanh.f32 %v2492_v41 }
 0x39b   :  { %3348 = vtanh.f32 %v2494_v61  ;;  %v2497_v16 = vpop.f32.mrb[44].mxu1 }
 0x39c   :  { %v3339_v55 = vpop.eup %3338  ;;  %v2498_v60 = vadd.f32 %v2497_v16, %v2340_v17  ;;  %v2499_v31 = vpop.f32.mrb[45].mxu1 }
 0x39d   :  { %v3341_v58 = vpop.eup %3340  ;;  %v2500_v11 = vadd.f32 %v2499_v31, %v2340_v17  ;;  %v3096_v53 = vpack.c.bf16 %v3339_v55, %v3335_v5  ;;  %v2563_v17 = vpop.permute.xlu0 %2562 }
 0x39e   :  { %v3094_v20 = vpack.c.bf16 %v3341_v58, %v3337_v12  ;;  %3350 = vtanh.f32 %v2498_v60 }
 0x39f   :  { %v2503_v42 = vpop.f32.mrb[46].mxu1  ;;  %3352 = vtanh.f32 %v2500_v11 }
 0x3a0   :  { %v2504_v45 = vadd.f32 %v2503_v42, %v2345_v40  ;;  %v2505_v52 = vpop.f32.mrb[47].mxu1  ;;  %3095 = vmatprep.subr.bf16.mxu0 %v3094_v20  ;;  %v3343_v43 = vpop.eup %3342 }
 0x3a1   :  { %v2506_v38 = vadd.f32 %v2505_v52, %v2345_v40  ;;  %3097 = vmatpush1.bf16.msra.mxu0 %v3096_v53  ;;  %v3345_v48 = vpop.eup %3344  ;;  %v2568_v40 = vpop.permute.xlu1 %2567 }
 0x3a2   :  { %3354 = vtanh.f32 %v2504_v45 }
 0x3a3   :  { %3356 = vtanh.f32 %v2506_v38 }
 0x3a4   :  { %v3347_v33 = vpop.eup %3346 }
 0x3a5   :  { %v3349_v32 = vpop.eup %3348  ;;  %v3100_v3 = vpack.c.bf16 %v3347_v33, %v3343_v43  ;;  %v2573_v33 = vpop.permute.xlu0 %2572 }
 0x3a6   :  { %v3098_v62 = vpack.c.bf16 %v3349_v32, %v3345_v48 }
 0x3a8   :  { %3099 = vmatprep.subr.bf16.mxu0 %v3098_v62  ;;  %v3351_v4 = vpop.eup %3350 }
 0x3a9   :  { %3101 = vmatpush1.bf16.msra.mxu0 %v3100_v3  ;;  %v3353_v14 = vpop.eup %3352 }
 0x3ac   :  { %v3355_v0 = vpop.eup %3354 }
 0x3ad   :  { %v3357_v28 = vpop.eup %3356  ;;  %v3104_v22 = vpack.c.bf16 %v3355_v0, %v3351_v4 }
 0x3ae   :  { %v3102_v51 = vpack.c.bf16 %v3357_v28, %v3353_v14 }
 0x3b0   :  { %3103 = vmatprep.subr.bf16.mxu0 %v3102_v51  ;;  %v2578_v51 = vpop.permute.xlu1 %2577 }
 0x3b1   :  { %3105 = vmatpush1.bf16.msra.mxu0 %v3104_v22 }
 0x3b4   :  { %2685 = vmatmul.mubr.f32.vlgmr.msra.gmra.mrb[16].mxu0 %v104_v10 }
 0x3b5   :  { %2690 = vmatprep.mubr.f32.mxu0 %v3463_v34 }
 0x3b8   :  { %2691 = vmatmul.mubr.f32.gmra.mrb[18].mxu0 %v105_v15 }
 0x3b9   :  { %2696 = vmatprep.mubr.f32.mxu0 %v3463_v34 }
 0x3bc   :  { %2697 = vmatmul.mubr.f32.gmra.mrb[20].mxu0 %v106_v50 }
 0x3bd   :  { %2702 = vmatprep.mubr.f32.mxu0 %v3463_v34 }
 0x3c0   :  { %2703 = vmatmul.mubr.f32.gmra.mrb[22].mxu0 %v107_v6 }
 0x3c1   :  { %2708 = vmatprep.mubr.f32.mxu0 %v3463_v34 }
 0x3c4   :  { %2709 = vmatmul.mubr.f32.gmra.mrb[24].mxu0 %v108_v18 }
 0x3c5   :  { %2714 = vmatprep.mubr.f32.mxu0 %v3463_v34 }
 0x3c8   :  { %2715 = vmatmul.mubr.f32.gmra.mrb[26].mxu0 %v109_v37 }
 0x3c9   :  { %2720 = vmatprep.mubr.f32.mxu0 %v3463_v34 }
 0x3cc   :  { %2721 = vmatmul.mubr.f32.gmra.mrb[28].mxu0 %v110_v39  ;;  %v2583_v39 = vpop.permute.xlu0 %2582 }
 0x3cd   :  { %2726 = vmatprep.mubr.f32.mxu0 %v3463_v34 }
 0x3d0   :  { %2727 = vmatmul.mubr.f32.gmra.mrb[30].mxu0 %v111_v1 }
 0x3d1   :  { %2732 = vmatprep.mubr.f32.mxu0 %v3463_v34 }
 0x3d4   :  { %2733 = vmatmul.mubr.f32.gmra.mrb[32].mxu0 %v112_v9 }
 0x3d5   :  { %2738 = vmatprep.mubr.f32.mxu0 %v3463_v34 }
 0x3d8   :  { %2739 = vmatmul.mubr.f32.gmra.mrb[34].mxu0 %v113_v24 }
 0x3d9   :  { %2744 = vmatprep.mubr.f32.mxu0 %v3463_v34 }
 0x3dc   :  { %2745 = vmatmul.mubr.f32.gmra.mrb[36].mxu0 %v114_v8 }
 0x3dd   :  { %2750 = vmatprep.mubr.f32.mxu0 %v3463_v34 }
 0x3e0   :  { %2751 = vmatmul.mubr.f32.gmra.mrb[38].mxu0 %v115_v27 }
 0x3e1   :  { %2756 = vmatprep.mubr.f32.mxu0 %v3463_v34 }
 0x3e4   :  { %2757 = vmatmul.mubr.f32.gmra.mrb[40].mxu0 %v116_v30 }
 0x3e5   :  { %2762 = vmatprep.mubr.f32.mxu0 %v3463_v34 }
 0x3e8   :  { %2763 = vmatmul.mubr.f32.gmra.mrb[42].mxu0 %v117_v46 }
 0x3e9   :  { %2768 = vmatprep.mubr.f32.mxu0 %v3463_v34 }
 0x3ec   :  { %2769 = vmatmul.mubr.f32.gmra.mrb[44].mxu0 %v118_v2 }
 0x3ed   :  { %2774 = vmatprep.mubr.f32.mxu0 %v3463_v34 }
 0x3f0   :  { %2775 = vmatmul.mubr.f32.gmra.mrb[46].mxu0 %v119_v49  ;;  %v2588_v49 = vpop.permute.xlu1 %2587 }
 0x487   :  { %v2686_v57 = vpop.f32.mrb[16].mxu0 }
 0x488   :  { %v2687_v54 = vadd.f32 %v2686_v57, %v2543_v25  ;;  %v2688_v26 = vpop.f32.mrb[17].mxu0 }
 0x489   :  { %v2689_v21 = vadd.f32 %v2688_v26, %v2543_v25 }
 0x48a   :  { %3358 = vtanh.f32 %v2687_v54 }
 0x48b   :  { %v2692_v44 = vpop.f32.mrb[18].mxu0  ;;  %3360 = vtanh.f32 %v2689_v21 }
 0x48c   :  { %v2693_v36 = vadd.f32 %v2692_v44, %v2548_v63  ;;  %v2694_v13 = vpop.f32.mrb[19].mxu0  ;;  %v2593_v44 = vpop.permute.xlu0 %2592 }
 0x48d   :  { %v2695_v7 = vadd.f32 %v2694_v13, %v2548_v63 }
 0x48e   :  { %3362 = vtanh.f32 %v2693_v36 }
 0x48f   :  { %3364 = vtanh.f32 %v2695_v7  ;;  %v2698_v34 = vpop.f32.mrb[20].mxu0 }
 0x490   :  { %v2699_v23 = vadd.f32 %v2698_v34, %v2553_v59  ;;  %v2700_v35 = vpop.f32.mrb[21].mxu0 }
 0x491   :  { %v2701_v19 = vadd.f32 %v2700_v35, %v2553_v59 }
 0x492   :  { %3366 = vtanh.f32 %v2699_v23 }
 0x493   :  { %v2704_v29 = vpop.f32.mrb[22].mxu0  ;;  %3368 = vtanh.f32 %v2701_v19 }
 0x494   :  { %v2705_v41 = vadd.f32 %v2704_v29, %v2558_v56  ;;  %v2706_v47 = vpop.f32.mrb[23].mxu0  ;;  %v3359_v5 = vpop.eup %3358 }
 0x495   :  { %v2707_v61 = vadd.f32 %v2706_v47, %v2558_v56  ;;  %v3361_v12 = vpop.eup %3360  ;;  %v2598_v56 = vpop.permute.xlu1 %2597 }
 0x496   :  { %3370 = vtanh.f32 %v2705_v41 }
 0x497   :  { %3372 = vtanh.f32 %v2707_v61  ;;  %v2710_v16 = vpop.f32.mrb[24].mxu0 }
 0x498   :  { %v3363_v55 = vpop.eup %3362  ;;  %v2711_v60 = vadd.f32 %v2710_v16, %v2563_v17  ;;  %v2712_v31 = vpop.f32.mrb[25].mxu0 }
 0x499   :  { %v3365_v58 = vpop.eup %3364  ;;  %v2713_v11 = vadd.f32 %v2712_v31, %v2563_v17  ;;  %v3108_v53 = vpack.c.bf16 %v3363_v55, %v3359_v5  ;;  %v2603_v17 = vpop.permute.xlu0 %2602 }
 0x49a   :  { %v3106_v20 = vpack.c.bf16 %v3365_v58, %v3361_v12  ;;  %3374 = vtanh.f32 %v2711_v60 }
 0x49b   :  { %v2716_v42 = vpop.f32.mrb[26].mxu0  ;;  %3376 = vtanh.f32 %v2713_v11 }
 0x49c   :  { %v2717_v45 = vadd.f32 %v2716_v42, %v2568_v40  ;;  %v2718_v52 = vpop.f32.mrb[27].mxu0  ;;  %3107 = vmatprep.subr.bf16.mxu1 %v3106_v20  ;;  %v3367_v43 = vpop.eup %3366 }
 0x49d   :  { %v2719_v38 = vadd.f32 %v2718_v52, %v2568_v40  ;;  %3109 = vmatpush1.bf16.msra.mxu1 %v3108_v53  ;;  %v3369_v48 = vpop.eup %3368  ;;  %v2608_v40 = vpop.permute.xlu1 %2607 }
 0x49e   :  { %3378 = vtanh.f32 %v2717_v45 }
 0x49f   :  { %3380 = vtanh.f32 %v2719_v38  ;;  %v2722_v32 = vpop.f32.mrb[28].mxu0 }
 0x4a0   :  { %v3371_v3 = vpop.eup %3370  ;;  %v2723_v62 = vadd.f32 %v2722_v32, %v2573_v33  ;;  %v2724_v4 = vpop.f32.mrb[29].mxu0 }
 0x4a1   :  { %v3373_v14 = vpop.eup %3372  ;;  %v2725_v0 = vadd.f32 %v2724_v4, %v2573_v33  ;;  %v3112_v28 = vpack.c.bf16 %v3371_v3, %v3367_v43  ;;  %v2613_v33 = vpop.permute.xlu0 %2612 }
 0x4a2   :  { %v3110_v22 = vpack.c.bf16 %v3373_v14, %v3369_v48  ;;  %3382 = vtanh.f32 %v2723_v62 }
 0x4a3   :  { %v2728_v10 = vpop.f32.mrb[30].mxu0  ;;  %3384 = vtanh.f32 %v2725_v0 }
 0x4a4   :  { %v2729_v15 = vadd.f32 %v2728_v10, %v2578_v51  ;;  %v2730_v50 = vpop.f32.mrb[31].mxu0  ;;  %3111 = vmatprep.subr.bf16.mxu1 %v3110_v22  ;;  %v3375_v18 = vpop.eup %3374 }
 0x4a5   :  { %v2731_v6 = vadd.f32 %v2730_v50, %v2578_v51  ;;  %3113 = vmatpush1.bf16.msra.mxu1 %v3112_v28  ;;  %v3377_v37 = vpop.eup %3376  ;;  %v2618_v51 = vpop.permute.xlu1 %2617 }
 0x4a6   :  { %3386 = vtanh.f32 %v2729_v15 }
 0x4a7   :  { %3388 = vtanh.f32 %v2731_v6  ;;  %v2734_v1 = vpop.f32.mrb[32].mxu0 }
 0x4a8   :  { %v3379_v9 = vpop.eup %3378  ;;  %v2735_v24 = vadd.f32 %v2734_v1, %v2583_v39  ;;  %v2736_v8 = vpop.f32.mrb[33].mxu0 }
 0x4a9   :  { %v3381_v27 = vpop.eup %3380  ;;  %v2737_v30 = vadd.f32 %v2736_v8, %v2583_v39  ;;  %v3116_v46 = vpack.c.bf16 %v3379_v9, %v3375_v18 }
 0x4aa   :  { %v3114_v2 = vpack.c.bf16 %v3381_v27, %v3377_v37  ;;  %3390 = vtanh.f32 %v2735_v24 }
 0x4ab   :  { %v2740_v25 = vpop.f32.mrb[34].mxu0  ;;  %3392 = vtanh.f32 %v2737_v30 }
 0x4ac   :  { %v2741_v57 = vadd.f32 %v2740_v25, %v2588_v49  ;;  %v2742_v54 = vpop.f32.mrb[35].mxu0  ;;  %3115 = vmatprep.subr.bf16.mxu1 %v3114_v2  ;;  %v3383_v21 = vpop.eup %3382  ;;  %v136_v25 = vld [vmem:[%s5164_s8] sm:$0x7]  ;;  %s3464_s8 = smov [#allocation2]  }
 0x4ad   :  { %v2743_v26 = vadd.f32 %v2742_v54, %v2588_v49  ;;  %3117 = vmatpush1.bf16.msra.mxu1 %v3116_v46  ;;  %v3385_v63 = vpop.eup %3384  ;;  %s2938_s17 = sshll.u32 %s3464_s8, 4  ;;  %s2939_s17 = int_to_ptr.vmem [resolvable:$true] %s2938_s17 }
 0x4ae   :  { %3394 = vtanh.f32 %v2741_v57  ;;  %v2816_v57 = vpop.permute.xlu0 %2815  ;;  %s3430_s18 = scalar_lea.vmem %s2939_s17, 128  ;;  %p3435_p1 = scmp.lt.s32.totalorder %s2939_s17, %s2939_s17 }
 0x4af   :  { %3396 = vtanh.f32 %v2743_v26  ;;  %v2746_v36 = vpop.f32.mrb[36].mxu0  ;;  %p3431_p0 = scmp.ne.s32.totalorder %s2939_s17, %s3430_s18  ;;  %p3436_p2 = scmp.lt.s32.totalorder %s3430_s18, %s3430_s18 }
 0x4b0   :  { %v3387_v13 = vpop.eup %3386  ;;  %v2747_v7 = vadd.f32 %v2746_v36, %v2593_v44  ;;  %v2748_v59 = vpop.f32.mrb[37].mxu0 }
 0x4b1   :  { %v3389_v34 = vpop.eup %3388  ;;  %v2749_v23 = vadd.f32 %v2748_v59, %v2593_v44  ;;  %v3120_v35 = vpack.c.bf16 %v3387_v13, %v3383_v21  ;;  %p3437_p3 = por %p3436_p2, %p3435_p1 }
 0x4b2   :  { %v3118_v19 = vpack.c.bf16 %v3389_v34, %v3385_v63  ;;  %3398 = vtanh.f32 %v2747_v7 }
 0x4b3   :  { %v2752_v29 = vpop.f32.mrb[38].mxu0  ;;  %3400 = vtanh.f32 %v2749_v23  ;;  %p3438_p4 = pnand %p3437_p3, %p3431_p0 }
 0x4b4   :  { %v2753_v41 = vadd.f32 %v2752_v29, %v2598_v56  ;;  %v2754_v47 = vpop.f32.mrb[39].mxu0  ;;  %3119 = vmatprep.subr.bf16.mxu1 %v3118_v19  ;;  %v3391_v5 = vpop.eup %3390 }
 0x4b5   :  { %v2755_v61 = vadd.f32 %v2754_v47, %v2598_v56  ;;  %3121 = vmatpush1.bf16.msra.mxu1 %v3120_v35  ;;  %v3393_v12 = vpop.eup %3392 }
 0x4b6   :  { %3402 = vtanh.f32 %v2753_v41 }
 0x4b7   :  { %3404 = vtanh.f32 %v2755_v61  ;;  %v2758_v16 = vpop.f32.mrb[40].mxu0 }
 0x4b8   :  { %v3395_v55 = vpop.eup %3394  ;;  %v2759_v60 = vadd.f32 %v2758_v16, %v2603_v17  ;;  %v2760_v31 = vpop.f32.mrb[41].mxu0 }
 0x4b9   :  { %v3397_v58 = vpop.eup %3396  ;;  %v2761_v11 = vadd.f32 %v2760_v31, %v2603_v17  ;;  %v3124_v53 = vpack.c.bf16 %v3395_v55, %v3391_v5 }
 0x4ba   :  { %v3122_v20 = vpack.c.bf16 %v3397_v58, %v3393_v12  ;;  %3406 = vtanh.f32 %v2759_v60 }
 0x4bb   :  { %v2764_v42 = vpop.f32.mrb[42].mxu0  ;;  %3408 = vtanh.f32 %v2761_v11 }
 0x4bc   :  { %v2765_v45 = vadd.f32 %v2764_v42, %v2608_v40  ;;  %v2766_v52 = vpop.f32.mrb[43].mxu0  ;;  %3123 = vmatprep.subr.bf16.mxu1 %v3122_v20  ;;  %v3399_v43 = vpop.eup %3398 }
 0x4bd   :  { %v2767_v38 = vadd.f32 %v2766_v52, %v2608_v40  ;;  %3125 = vmatpush1.bf16.msra.mxu1 %v3124_v53  ;;  %v3401_v48 = vpop.eup %3400  ;;  %v5273_v40 = vld [vmem:[#allocation5_spill] sm:$0xff] }
 0x4be   :  { %3410 = vtanh.f32 %v2765_v45  ;;  %vm140_vm2 = vcmp.eq.s32.totalorder %v5273_v40, 0 }
 0x4bf   :  { %3412 = vtanh.f32 %v2767_v38  ;;  %v2770_v32 = vpop.f32.mrb[44].mxu0 }
 0x4c0   :  { %v3403_v3 = vpop.eup %3402  ;;  %v2771_v62 = vadd.f32 %v2770_v32, %v2613_v33  ;;  %v2772_v4 = vpop.f32.mrb[45].mxu0 }
 0x4c1   :  { %v3405_v14 = vpop.eup %3404  ;;  %v2773_v0 = vadd.f32 %v2772_v4, %v2613_v33  ;;  %v3128_v28 = vpack.c.bf16 %v3403_v3, %v3399_v43 }
 0x4c2   :  { %v3126_v22 = vpack.c.bf16 %v3405_v14, %v3401_v48  ;;  %3414 = vtanh.f32 %v2771_v62 }
 0x4c3   :  { %v2776_v10 = vpop.f32.mrb[46].mxu0  ;;  %3416 = vtanh.f32 %v2773_v0 }
 0x4c4   :  { %v2777_v15 = vadd.f32 %v2776_v10, %v2618_v51  ;;  %v2778_v50 = vpop.f32.mrb[47].mxu0  ;;  %3127 = vmatprep.subr.bf16.mxu1 %v3126_v22  ;;  %v3407_v18 = vpop.eup %3406 }
 0x4c5   :  { %v2779_v6 = vadd.f32 %v2778_v50, %v2618_v51  ;;  %3129 = vmatpush1.bf16.msra.mxu1 %v3128_v28  ;;  %v3409_v37 = vpop.eup %3408 }
 0x4c6   :  { %3418 = vtanh.f32 %v2777_v15 }
 0x4c7   :  { %3420 = vtanh.f32 %v2779_v6 }
 0x4c8   :  { %v3411_v39 = vpop.eup %3410 }
 0x4c9   :  { %v3413_v1 = vpop.eup %3412  ;;  %v3132_v9 = vpack.c.bf16 %v3411_v39, %v3407_v18 }
 0x4ca   :  { %v3130_v24 = vpack.c.bf16 %v3413_v1, %v3409_v37 }
 0x4cc   :  { %3131 = vmatprep.subr.bf16.mxu1 %v3130_v24  ;;  %v3415_v8 = vpop.eup %3414 }
 0x4cd   :  { %3133 = vmatpush1.bf16.msra.mxu1 %v3132_v9  ;;  %v3417_v27 = vpop.eup %3416 }
 0x4d0   :  { %v3419_v30 = vpop.eup %3418 }
 0x4d1   :  { %v3421_v46 = vpop.eup %3420  ;;  %v3136_v2 = vpack.c.bf16 %v3419_v30, %v3415_v8 }
 0x4d2   :  { %v3134_v49 = vpack.c.bf16 %v3421_v46, %v3417_v27 }
 0x4d4   :  { %3135 = vmatprep.subr.bf16.mxu1 %v3134_v49 }
 0x4d5   :  { %3137 = vmatpush1.bf16.msra.mxu1 %v3136_v2 }
 0x4d8   :  { %2883 = vmatmul.mubr.f32.vlgmr.msra.gmra.mrb[48].mxu1 %v136_v25 }
 0x5ab   :  { %v2884_v54 = vpop.f32.mrb[48].mxu1 }
 0x5ac   :  { %v2885_v26 = vadd.f32 %v2884_v54, %v2816_v57  ;;  %v2886_v21 = vpop.f32.mrb[49].mxu1 }
 0x5ad   :  { %v2887_v63 = vadd.f32 %v2886_v21, %v2816_v57 }
 0x5ae   :  { %v2895_v44 = vand.u32 2147483647, %v2885_v26  ;;  %v2889_v31 = vmax.f32 %v2885_v26, 0.0  ;;  %vm2891_vm3 = vcmp.ne.f32.partialorder %v2885_v26, %v2885_v26 }
 0x5af   :  { %v2896_v36 = vand.u32 2147483647, %v2887_v63  ;;  %v2890_v53 = vmax.f32 %v2887_v63, 0.0  ;;  %vm2892_vm4 = vcmp.ne.f32.partialorder %v2887_v63, %v2887_v63 }
 0x5b0   :  { %v2897_v13 = vsub.f32 0.0, %v2895_v44 }
 0x5b1   :  { %v2898_v7 = vsub.f32 0.0, %v2896_v36 }
 0x5b2   :  { %v2899_v59 = vmul.f32 1.442695, %v2897_v13 }
 0x5b3   :  { %v2901_v34 = vmul.f32 1.442695, %v2898_v7 }
 0x5b4   :  { %3422 = vpow2.f32 %v2899_v59 }
 0x5b5   :  { %3424 = vpow2.f32 %v2901_v34 }
 0x5be   :  { %v3423_v23 = vpop.eup %3422 }
 0x5bf   :  { %v3425_v35 = vpop.eup %3424  ;;  %v2903_v19 = vadd.f32 1.0, %v3423_v23  ;;  %v2906_v29 = vmul.f32 -0.5, %v3423_v23  ;;  %v2909_v61 = vand.u32 2147483647, %v3423_v23 }
 0x5c0   :  { %v2912_v56 = vadd.f32 1.0, %v3425_v35  ;;  %v2915_v41 = vmul.f32 -0.5, %v3425_v35  ;;  %v2918_v12 = vand.u32 2147483647, %v3425_v35 }
 0x5c1   :  { %3426 = vlog2.f32 %v2903_v19  ;;  %v2907_v47 = vadd.f32 1.0, %v2906_v29  ;;  %vm2910_vm11 = vcmp.lt.f32.partialorder %v2909_v61, 0.0004427343 }
 0x5c2   :  { %3428 = vlog2.f32 %v2912_v56  ;;  %v2916_v5 = vadd.f32 1.0, %v2915_v41  ;;  %vm2919_vm7 = vcmp.lt.f32.partialorder %v2918_v12, 0.0004427343 }
 0x5c3   :  { %v2908_v60 = vmul.f32 %v3423_v23, %v2907_v47 }
 0x5c4   :  { %v2917_v11 = vmul.f32 %v3425_v35, %v2916_v5 }
 0x5cb   :  { %v3427_v17 = vpop.eup %3426 }
 0x5cc   :  { %v3429_v16 = vpop.eup %3428  ;;  %v2905_v55 = vmul.f32 0.6931472, %v3427_v17 }
 0x5cd   :  { %v2914_v58 = vmul.f32 0.6931472, %v3429_v16 }
 0x5ce   :  { %v2911_v20 = vsel %vm2910_vm11, %v2908_v60, %v2905_v55 }
 0x5cf   :  { %v2920_v42 = vsel %vm2919_vm7, %v2917_v11, %v2914_v58  ;;  %v2921_v45 = vadd.f32 %v2911_v20, %v2889_v31 }
 0x5d0   :  { %v2922_v52 = vadd.f32 %v2920_v42, %v2890_v53 }
 0x5d1   :  { %v2923_v38 = vsel %vm2891_vm3, %v2885_v26, %v2921_v45 }
 0x5d2   :  { %v2924_v43 = vsel %vm2892_vm4, %v2887_v63, %v2922_v52  ;;  %v2925_v48 = vsel %vm140_vm2, %v2923_v38, %v2885_v26 }
 0x5d3   :  { %v2926_v33 = vsel %vm140_vm2, %v2924_v43, %v2887_v63 }
 0x5d4   :  { %v2929_v32 = vcombine.low %v2925_v48, %v2926_v33 }
 0x5d6   :  { %2931 = vst [vmem:[#allocation2] sm:$0x77] %v2929_v32 }
 0x5d7   :  { %3441 = shalt.err (!%p3438_p4)
}
 0x5d8   :  { %s3442_s20 = scalar_lea.hbm %s5166_s10, 128 }
 0x5d9   :  { %p3443_p5 = scmp.ne.s32.totalorder %s5166_s10, %s3442_s20  ;;  %p3446_p6 = scmp.lt.u32.totalorder %s3442_s20, %s5166_s10 }
 0x5db   :  { %p3448_p7 = pnand %p3446_p6, %p3443_p5 }
 0x5dd   :  { %3451 = shalt.err (!%p3448_p7)
}
 0x5de   :  { %2941 = dma.vmem_to_hbm [thread:$0]  %s2939_s17, 128, %s5166_s10, [#allocation3]  }
 0x5df   :  { %3452 = dma.done.wait [#allocation3], 128  }
 0x5e0   :  { %3453 = vsyncadd [#allocation3], 4294967168 }
 0x5e1   :  { %2945 = vsyncpa [#allocation3], 1 }

</bundles_post_ra>
